<compile_context>
chip_gen: v7x
topology: tpu7x:2x2x1
jax: 0.10.0
libtpu: 0.0.40
codegen_flags: <defaults>
</compile_context>

<pallas_src>
import jax
import jax.numpy as jnp
from jax.experimental import pallas as pl
from jax.experimental.pallas import tpu as pltpu

IN_FEATURES = 3 * 32 * 32   # 3072
OUT_FEATURES = 10
N_PAD = 128                 # lane-dense output width


def _round_up(x, m):
    return ((x + m - 1) // m) * m


def _linear_kernel(x_ref, w_ref, b_ref, o_ref):
    """One B-tile of  out = x @ W_t + b  (W_t, b resident & lane-padded)."""
    o_ref[...] = (
        jnp.dot(x_ref[...], w_ref[...], preferred_element_type=jnp.float32)
        + b_ref[...]
    ).astype(o_ref.dtype)


def prepare_params(weight, bias):
    """One-time parameter prep (hoisted off the per-call hot path).

    weight: (10, 3072) f32 in PyTorch nn.Linear layout; bias: (10,) f32.
    Returns W_t (3072, 128) and bias (1, 128), lane-padded with zeros so the
    padded logits columns are exactly zero.
    """
    w_t = (
        jnp.zeros((IN_FEATURES, N_PAD), jnp.float32)
        .at[:, :OUT_FEATURES]
        .set(weight.T)
    )
    b2d = (
        jnp.zeros((1, N_PAD), jnp.float32)
        .at[:, :OUT_FEATURES]
        .set(bias)
    )
    return w_t, b2d


def logistic_regression_forward(x_nchw, w_t, b2d, *, tb_max=512):
    """x_nchw: (B, 3, 32, 32) f32; w_t/b2d from prepare_params().
    Returns logits (B, 10) f32, identical to the PyTorch module's forward."""
    B = x_nchw.shape[0]
    K = IN_FEATURES

    # Flatten exactly like torch's x.view(-1, 3*32*32) on contiguous NCHW.
    x2d = x_nchw.reshape(B, K)

    # B tile: multiple of 8 sublanes, small enough for VMEM, and chosen so the
    # grid has >= 2 programs when possible (megacore split on v7x).
    tb = min(tb_max, _round_up(max(pl.cdiv(B, 2), 1), 8))
    grid = (pl.cdiv(B, tb),)

    out = pl.pallas_call(
        _linear_kernel,
        out_shape=jax.ShapeDtypeStruct((B, N_PAD), jnp.float32),
        grid_spec=pltpu.PrefetchScalarGridSpec(
            num_scalar_prefetch=0,
            grid=grid,
            in_specs=[
                # x tile: (tb, K) streamed over B; partial last block handled
                # by Pallas (out-of-range rows are never written back).
                pl.BlockSpec((tb, K), lambda i: (i, 0)),
                # W_t: full (K, 128), resident across the whole grid.
                pl.BlockSpec((K, N_PAD), lambda i: (0, 0)),
                # bias: full (1, 128), resident.
                pl.BlockSpec((1, N_PAD), lambda i: (0, 0)),
            ],
            out_specs=pl.BlockSpec((tb, N_PAD), lambda i: (i, 0)),
        ),
        compiler_params=pltpu.CompilerParams(
            dimension_semantics=("parallel",),   # B is independent -> megacore
            vmem_limit_bytes=32 << 20,           # ~2x real footprint, v7x-safe
        ),
    )(x2d, w_t, b2d)

    # Strip the lane padding on N (padded columns are exactly zero).
    return out[:, :OUT_FEATURES]


if __name__ == "__main__":
    key = jax.random.PRNGKey(0)
    kx, kw, kb = jax.random.split(key, 3)

    # Small batch of CIFAR-shaped inputs (NCHW).
    B = 2
    x = jax.random.normal(kx, (B, 3, 32, 32), dtype=jnp.float32)

    # Deterministic parameter init mimicking nn.Linear's U(-1/sqrt(fan_in), +).
    bound = 1.0 / (IN_FEATURES ** 0.5)
    weight = jax.random.uniform(
        kw, (OUT_FEATURES, IN_FEATURES), jnp.float32, -bound, bound
    )
    bias = jax.random.uniform(kb, (OUT_FEATURES,), jnp.float32, -bound, bound)

    # One-time parameter prep (off the inference hot path).
    w_t, b2d = prepare_params(weight, bias)

    logits = logistic_regression_forward(x, w_t, b2d)
    logits = jax.block_until_ready(logits)

    # Cross-check against plain JAX reference.
    ref = x.reshape(B, IN_FEATURES) @ weight.T + bias
    assert logits.shape == (B, OUT_FEATURES)
    assert jnp.allclose(logits, ref, atol=1e-4, rtol=1e-4)

    print("KERNEL_OK")
</pallas_src>

<mosaic_0001>
module attributes {stable_mosaic.version = 11 : i64} {
  func.func @_linear_kernel(%arg0: i32, %arg1: memref<8x3072xf32, #tpu.memory_space<vmem>>, %arg2: memref<3072x128xf32, #tpu.memory_space<vmem>>, %arg3: memref<1x128xf32, #tpu.memory_space<vmem>>, %arg4: memref<8x128xf32, #tpu.memory_space<vmem>>) attributes {dimension_semantics = [#tpu.dimension_semantics<parallel>], iteration_bounds = array<i64: 1>, scalar_prefetch = 0 : i64, scratch_operands = 0 : i64, tpu.core_type = #tpu.core_type<tc>, window_params = [{transform_indices = @transform_0, window_bounds = array<i64: 8, 3072>}, {pipeline_mode = #tpu.pipeline_mode<synchronous>, transform_indices = @transform_1, window_bounds = array<i64: 3072, 128>}, {pipeline_mode = #tpu.pipeline_mode<synchronous>, transform_indices = @transform_2, window_bounds = array<i64: 1, 128>}, {transform_indices = @transform_3, window_bounds = array<i64: 8, 128>}]} {
    %c0 = arith.constant 0 : index
    %c0_0 = arith.constant 0 : index
    %0 = vector.load %arg1[%c0, %c0_0] : memref<8x3072xf32, #tpu.memory_space<vmem>>, vector<8x3072xf32>
    %c0_1 = arith.constant 0 : index
    %c0_2 = arith.constant 0 : index
    %1 = vector.load %arg2[%c0_1, %c0_2] : memref<3072x128xf32, #tpu.memory_space<vmem>>, vector<3072x128xf32>
    %cst = arith.constant dense<0.000000e+00> : vector<8x128xf32>
    %2 = tpu.matmul %0, %1, %cst {dimension_numbers = #tpu.dot_dimension_numbers<[1], [0], [0], [1], [0, 0, 1, 1], [], []>} : vector<8x3072xf32>, vector<3072x128xf32>, vector<8x128xf32> -> vector<8x128xf32>
    %c0_3 = arith.constant 0 : index
    %c0_4 = arith.constant 0 : index
    %3 = vector.load %arg3[%c0_3, %c0_4] : memref<1x128xf32, #tpu.memory_space<vmem>>, vector<1x128xf32>
    %4 = vector.broadcast %3 : vector<1x128xf32> to vector<8x128xf32>
    %5 = arith.addf %2, %4 : vector<8x128xf32>
    %c0_5 = arith.constant 0 : index
    %c0_6 = arith.constant 0 : index
    %6 = vector.load %arg4[%c0_5, %c0_6] : memref<8x128xf32, #tpu.memory_space<vmem>>, vector<8x128xf32>
    tpu.vector_store %arg4[%c0_5, %c0_6], %5 {strides = array<i32>} : memref<8x128xf32, #tpu.memory_space<vmem>>, vector<8x128xf32>,
    return
  }
  func.func @transform_0(%arg0: i32) -> (i32, i32) {
    %c0_i32 = arith.constant 0 : i32
    %c0_i32_0 = arith.constant 0 : i32
    return %arg0, %c0_i32 : i32, i32
  }
  func.func @transform_1(%arg0: i32) -> (i32, i32) {
    %c0_i32 = arith.constant 0 : i32
    %c0_i32_0 = arith.constant 0 : i32
    %c0_i32_1 = arith.constant 0 : i32
    return %c0_i32, %c0_i32_0 : i32, i32
  }
  func.func @transform_2(%arg0: i32) -> (i32, i32) {
    %c0_i32 = arith.constant 0 : i32
    %c0_i32_0 = arith.constant 0 : i32
    %c0_i32_1 = arith.constant 0 : i32
    return %c0_i32, %c0_i32_0 : i32, i32
  }
  func.func @transform_3(%arg0: i32) -> (i32, i32) {
    %c0_i32 = arith.constant 0 : i32
    %c0_i32_0 = arith.constant 0 : i32
    return %arg0, %c0_i32 : i32, i32
  }
}

</mosaic_0001>

<bundles_post_ra>
// kernel: tpu_custom_call.1
= control target key start
LH: loop header
LB: loop body
LE: loop exit
PB: predicated region body
PF: predicated region fallthrough
CT: control target
= control target key end

     0   :  { %8 = vsyncpa [#allocation3], 0  ;;  %s2723_s0 = inlined_call_operand.hbm [shape: f32[2,3072], index: 0, kind: input, shape index: {}]   ;;  %s2724_s1 = inlined_call_operand.hbm [shape: f32[3072,128], index: 1, kind: input, shape index: {}]   ;;  %s2725_s2 = inlined_call_operand.hbm [shape: f32[1,128], index: 2, kind: input, shape index: {}]   ;;  %s2726_s3 = inlined_call_operand.hbm [shape: f32[2,128], index: 3, kind: output, shape index: {}]  }
   0x1   :  { %9 = vsyncpa [#allocation6], 0 }
   0x2   :  { %10 = vsyncpa [#allocation4], 0 }
   0x3   :  { %15 = vsyncadd [#allocation3], 2304  ;;  %s2538_s12 = smov [#allocation5]   ;;  %s2444_s16 = scalar_lea.hbm %s2724_s1, 49152 }
   0x4   :  { %s28_s13 = sshll.u32 %s2538_s12, 4  ;;  %p2445_p0 = scmp.ne.s32.totalorder %s2724_s1, %s2444_s16  ;;  %s29_s13 = int_to_ptr.vmem [resolvable:$true] %s28_s13 }
   0x5   :  { %p2448_p1 = scmp.lt.u32.totalorder %s2444_s16, %s2724_s1 }
   0x7   :  { %p2450_p2 = pnand %p2448_p1, %p2445_p0 }
   0x9   :  { %2453 = shalt.err (!%p2450_p2)
}
   0xa   :  { %s2454_s21 = scalar_lea.vmem %s29_s13, 49152  ;;  %p2459_p4 = scmp.lt.s32.totalorder %s29_s13, %s29_s13 }
   0xb   :  { %p2455_p3 = scmp.ne.s32.totalorder %s29_s13, %s2454_s21  ;;  %p2460_p5 = scmp.lt.s32.totalorder %s2454_s21, %s2454_s21 }
   0xd   :  { %p2461_p6 = por %p2460_p5, %p2459_p4 }
   0xf   :  { %p2462_p7 = pnand %p2461_p6, %p2455_p3 }
  0x11   :  { %2465 = shalt.err (!%p2462_p7)
}
  0x12   :  { %s2539_s22 = smov 128   ;;  %s2540_s23 = smov 8  }
  0x13   :  { %34 = dma.hbm_to_vmem [thread:$0]  %s2724_s1, 49152, %s29_s13, [#allocation6], %s2539_s22, %s2539_s22, %s2540_s23  }
  0x14   :  { %s2541_s26 = smov [#allocation2]   ;;  %s2466_s30 = scalar_lea.hbm %s2723_s0, 768 }
  0x15   :  { %s16_s27 = sshll.u32 %s2541_s26, 4  ;;  %p2467_p8 = scmp.ne.s32.totalorder %s2723_s0, %s2466_s30  ;;  %s17_s27 = int_to_ptr.vmem [resolvable:$true] %s16_s27 }
  0x16   :  { %p2470_p9 = scmp.lt.u32.totalorder %s2466_s30, %s2723_s0 }
  0x18   :  { %p2472_p10 = pnand %p2470_p9, %p2467_p8 }
  0x1a   :  { %2475 = shalt.err (!%p2472_p10)
}
  0x1b   :  { %s2476_s8 = scalar_lea.vmem %s17_s27, 768  ;;  %s2480_s1 = scalar_lea.vmem %s17_s27, 3072 }
  0x1c   :  { %p2477_p11 = scmp.ne.s32.totalorder %s17_s27, %s2476_s8  ;;  %p2481_p12 = scmp.lt.s32.totalorder %s17_s27, %s17_s27 }
  0x1d   :  { %p2482_p13 = scmp.lt.s32.totalorder %s2480_s1, %s2476_s8 }
  0x1f   :  { %p2483_p0 = por %p2482_p13, %p2481_p12 }
  0x21   :  { %p2484_p1 = pnand %p2483_p0, %p2477_p11 }
  0x23   :  { %2487 = shalt.err (!%p2484_p1)
}
  0x24   :  { %s2542_s9 = smov 768   ;;  %s2543_s10 = smov 48  }
  0x25   :  { %22 = dma.hbm_to_vmem [thread:$0]  %s2723_s0, 768, %s17_s27, [#allocation3], %s2542_s9, %s2542_s9, %s2543_s10  }
  0x26   :  { %s2544_s13 = smov [#allocation7]   ;;  %s2488_s17 = scalar_lea.hbm %s2725_s2, 16 }
  0x27   :  { %s41_s14 = sshll.u32 %s2544_s13, 4  ;;  %p2489_p2 = scmp.ne.s32.totalorder %s2725_s2, %s2488_s17  ;;  %s42_s14 = int_to_ptr.vmem [resolvable:$true] %s41_s14 }
  0x28   :  { %p2492_p3 = scmp.lt.u32.totalorder %s2488_s17, %s2725_s2 }
  0x2a   :  { %p2494_p4 = pnand %p2492_p3, %p2489_p2 }
  0x2c   :  { %2497 = shalt.err (!%p2494_p4)
}
  0x2d   :  { %s2498_s22 = scalar_lea.vmem %s42_s14, 16  ;;  %s2502_s0 = scalar_lea.vmem %s42_s14, 32 }
  0x2e   :  { %p2499_p5 = scmp.ne.s32.totalorder %s42_s14, %s2498_s22  ;;  %p2503_p6 = scmp.lt.s32.totalorder %s42_s14, %s42_s14 }
  0x2f   :  { %p2504_p7 = scmp.lt.s32.totalorder %s2502_s0, %s2498_s22 }
  0x31   :  { %p2505_p8 = por %p2504_p7, %p2503_p6 }
  0x33   :  { %p2506_p9 = pnand %p2505_p8, %p2499_p5 }
  0x35   :  { %2509 = shalt.err (!%p2506_p9)
}
  0x36   :  { %44 = dma.hbm_to_vmem [thread:$0]  %s2725_s2, 16, %s42_s14, [#allocation6]  }
  0x37   :  { %2532 = dma.done.wait [#allocation3], 3072  }
  0x38   :  { %2533 = vsyncadd [#allocation3], 4294964224 }
  0x39   :  { %2534 = dma.done.wait [#allocation6], 49168  }
  0x3a   :  { %2535 = vsyncadd [#allocation6], 4294918128  ;;  %v94_v0 = vld [vmem:[#allocation5 + $0x80] sm:$0xff]  ;;  %v95_v1 = vld [vmem:[#allocation5 + $0x88] sm:$0xff]  ;;  %v2545_v51 = vmov 1983009808   ;;  %v500_v53 = vlaneseq }
  0x3b   :  { %v78_v2 = vld [vmem:[#allocation5] sm:$0xff]  ;;  %v2013_v3 = vpack.c.bf16 %v95_v1, %v94_v0  ;;  %v79_v4 = vld [vmem:[#allocation5 + $0x8] sm:$0xff]  ;;  %v96_v11 = vld [vmem:[#allocation5 + $0x90] sm:$0xff]  ;;  %v498_v52 = vunpack.c.l.s4 %v2545_v51 }
  0x3c   :  { %v126_v5 = vld [vmem:[#allocation5 + $0x180] sm:$0xff]  ;;  %v127_v6 = vld [vmem:[#allocation5 + $0x188] sm:$0xff]  ;;  %v2015_v7 = vpack.c.bf16 %v79_v4, %v78_v2  ;;  %v97_v13 = vld [vmem:[#allocation5 + $0x98] sm:$0xff] }
  0x3d   :  { %v2045_v8 = vpack.c.bf16 %v127_v6, %v126_v5  ;;  %v110_v9 = vld [vmem:[#allocation5 + $0x100] sm:$0xff]  ;;  %v111_v10 = vld [vmem:[#allocation5 + $0x108] sm:$0xff]  ;;  %2014 = vmatprep.subr.bf16.mxu0 %v2013_v3  ;;  %v80_v14 = vld [vmem:[#allocation5 + $0x10] sm:$0xff]  ;;  %v2017_v16 = vpack.c.bf16 %v97_v13, %v96_v11  ;;  %v499_v2 = vunpack.c.0.s8 %v498_v52  ;;  %v501_v3 = vshrl.u32 %v500_v53, 7 }
  0x3e   :  { %v2047_v12 = vpack.c.bf16 %v111_v10, %v110_v9  ;;  %v81_v15 = vld [vmem:[#allocation5 + $0x18] sm:$0xff]  ;;  %2016 = vmatpush3.bf16.msra.mxu0 %v2015_v7  ;;  %v128_v18 = vld [vmem:[#allocation5 + $0x190] sm:$0xff]  ;;  %v98_v23 = vld [vmem:[#allocation5 + $0xa0] sm:$0xff] }
  0x3f   :  { %2046 = vmatprep.subr.bf16.mxu1 %v2045_v8  ;;  %v2019_v17 = vpack.c.bf16 %v81_v15, %v80_v14  ;;  %v129_v19 = vld [vmem:[#allocation5 + $0x198] sm:$0xff]  ;;  %v112_v20 = vld [vmem:[#allocation5 + $0x110] sm:$0xff]  ;;  %v99_v24 = vld [vmem:[#allocation5 + $0xa8] sm:$0xff]  ;;  %2018 = vmatprep.subr.bf16.mxu0 %v2017_v16 }
  0x40   :  { %2048 = vmatpush3.bf16.msra.mxu1 %v2047_v12  ;;  %v2049_v21 = vpack.c.bf16 %v129_v19, %v128_v18  ;;  %v113_v22 = vld [vmem:[#allocation5 + $0x118] sm:$0xff]  ;;  %v2021_v26 = vpack.c.bf16 %v99_v24, %v98_v23  ;;  %v82_v27 = vld [vmem:[#allocation5 + $0x20] sm:$0xff]  ;;  %v83_v28 = vld [vmem:[#allocation5 + $0x28] sm:$0xff] }
  0x41   :  { %v2051_v25 = vpack.c.bf16 %v113_v22, %v112_v20  ;;  %v130_v29 = vld [vmem:[#allocation5 + $0x1a0] sm:$0xff]  ;;  %v131_v30 = vld [vmem:[#allocation5 + $0x1a8] sm:$0xff]  ;;  %v2023_v33 = vpack.c.bf16 %v83_v28, %v82_v27  ;;  %v100_v35 = vld [vmem:[#allocation5 + $0xb0] sm:$0xff] }
  0x42   :  { %2050 = vmatprep.subr.bf16.mxu1 %v2049_v21  ;;  %v114_v31 = vld [vmem:[#allocation5 + $0x120] sm:$0xff]  ;;  %v115_v32 = vld [vmem:[#allocation5 + $0x128] sm:$0xff]  ;;  %2020 = vmatpush3.bf16.msra.mxu0 %v2019_v17  ;;  %v2053_v34 = vpack.c.bf16 %v131_v30, %v130_v29  ;;  %v101_v36 = vld [vmem:[#allocation5 + $0xb8] sm:$0xff]  ;;  %v2605_v21 = vsub.s32 %v499_v2, %v501_v3 }
  0x43   :  { %v84_v37 = vld [vmem:[#allocation5 + $0x30] sm:$0xff]  ;;  %2022 = vmatprep.subr.bf16.mxu0 %v2021_v26  ;;  %v2055_v38 = vpack.c.bf16 %v115_v32, %v114_v31  ;;  %v2025_v39 = vpack.c.bf16 %v101_v36, %v100_v35  ;;  %v85_v40 = vld [vmem:[#allocation5 + $0x38] sm:$0xff]  ;;  %v102_v46 = vld [vmem:[#allocation5 + $0xc0] sm:$0xff] }
  0x44   :  { %2052 = vmatpush3.bf16.msra.mxu1 %v2051_v25  ;;  %v132_v41 = vld [vmem:[#allocation5 + $0x1b0] sm:$0xff]  ;;  %v133_v42 = vld [vmem:[#allocation5 + $0x1b8] sm:$0xff]  ;;  %v103_v47 = vld [vmem:[#allocation5 + $0xc8] sm:$0xff]  ;;  %v2027_v48 = vpack.c.bf16 %v85_v40, %v84_v37 }
  0x45   :  { %2054 = vmatprep.subr.bf16.mxu1 %v2053_v34  ;;  %v2057_v43 = vpack.c.bf16 %v133_v42, %v132_v41  ;;  %v116_v44 = vld [vmem:[#allocation5 + $0x130] sm:$0xff]  ;;  %v117_v45 = vld [vmem:[#allocation5 + $0x138] sm:$0xff]  ;;  %v134_v49 = vld [vmem:[#allocation5 + $0x1c0] sm:$0xff]  ;;  %v2029_v55 = vpack.c.bf16 %v103_v47, %v102_v46 }
  0x46   :  { %2024 = vmatpush3.bf16.msra.mxu0 %v2023_v33  ;;  %v135_v50 = vld [vmem:[#allocation5 + $0x1c8] sm:$0xff]  ;;  %v2059_v54 = vpack.c.bf16 %v117_v45, %v116_v44  ;;  %v86_v56 = vld [vmem:[#allocation5 + $0x40] sm:$0xff]  ;;  %v104_v61 = vld [vmem:[#allocation5 + $0xd0] sm:$0xff] }
  0x47   :  { %2026 = vmatprep.subr.bf16.mxu0 %v2025_v39  ;;  %v87_v57 = vld [vmem:[#allocation5 + $0x48] sm:$0xff]  ;;  %v118_v58 = vld [vmem:[#allocation5 + $0x140] sm:$0xff]  ;;  %v2061_v59 = vpack.c.bf16 %v135_v50, %v134_v49  ;;  %v105_v62 = vld [vmem:[#allocation5 + $0xd8] sm:$0xff] }
  0x48   :  { %2056 = vmatpush3.bf16.msra.mxu1 %v2055_v38  ;;  %v119_v60 = vld [vmem:[#allocation5 + $0x148] sm:$0xff]  ;;  %v136_v63 = vld [vmem:[#allocation5 + $0x1d0] sm:$0xff]  ;;  %v137_v0 = vld [vmem:[#allocation5 + $0x1d8] sm:$0xff]  ;;  %v2031_v1 = vpack.c.bf16 %v87_v57, %v86_v56  ;;  %v2033_v5 = vpack.c.bf16 %v105_v62, %v104_v61 }
  0x49   :  { %2058 = vmatprep.subr.bf16.mxu1 %v2057_v43  ;;  %v2063_v4 = vpack.c.bf16 %v119_v60, %v118_v58  ;;  %v88_v6 = vld [vmem:[#allocation5 + $0x50] sm:$0xff]  ;;  %v89_v7 = vld [vmem:[#allocation5 + $0x58] sm:$0xff]  ;;  %v2065_v9 = vpack.c.bf16 %v137_v0, %v136_v63  ;;  %v106_v11 = vld [vmem:[#allocation5 + $0xe0] sm:$0xff] }
  0x4a   :  { %2028 = vmatpush3.bf16.msra.mxu0 %v2027_v48  ;;  %v120_v8 = vld [vmem:[#allocation5 + $0x150] sm:$0xff]  ;;  %v121_v10 = vld [vmem:[#allocation5 + $0x158] sm:$0xff]  ;;  %v107_v12 = vld [vmem:[#allocation5 + $0xe8] sm:$0xff]  ;;  %v2035_v17 = vpack.c.bf16 %v89_v7, %v88_v6 }
  0x4b   :  { %2030 = vmatprep.subr.bf16.mxu0 %v2029_v55  ;;  %v90_v13 = vld [vmem:[#allocation5 + $0x60] sm:$0xff]  ;;  %v91_v14 = vld [vmem:[#allocation5 + $0x68] sm:$0xff]  ;;  %v108_v20 = vld [vmem:[#allocation5 + $0xf0] sm:$0xff]  ;;  %v2067_v22 = vpack.c.bf16 %v121_v10, %v120_v8  ;;  %v2037_v23 = vpack.c.bf16 %v107_v12, %v106_v11 }
  0x4c   :  { %2060 = vmatpush3.bf16.msra.mxu1 %v2059_v54  ;;  %v138_v15 = vld [vmem:[#allocation5 + $0x1e0] sm:$0xff]  ;;  %v139_v16 = vld [vmem:[#allocation5 + $0x1e8] sm:$0xff]  ;;  %v109_v24 = vld [vmem:[#allocation5 + $0xf8] sm:$0xff]  ;;  %v2039_v30 = vpack.c.bf16 %v91_v14, %v90_v13 }
  0x4d   :  { %2062 = vmatprep.subr.bf16.mxu1 %v2061_v59  ;;  %v122_v18 = vld [vmem:[#allocation5 + $0x160] sm:$0xff]  ;;  %v123_v19 = vld [vmem:[#allocation5 + $0x168] sm:$0xff]  ;;  %v2069_v25 = vpack.c.bf16 %v139_v16, %v138_v15  ;;  %v140_v27 = vld [vmem:[#allocation5 + $0x1f0] sm:$0xff]  ;;  %v2041_v35 = vpack.c.bf16 %v109_v24, %v108_v20 }
  0x4e   :  { %2032 = vmatpush3.bf16.msra.mxu0 %v2031_v1  ;;  %v2408_v26 = vld [vmem:[#allocation2] ss:$48 sps:$4 sm:$0xff]   ;;  %v141_v28 = vld [vmem:[#allocation5 + $0x1f8] sm:$0xff]  ;;  %v2412_v32 = vld [vmem:[#allocation2 + $0x4] ss:$48 sps:$4 sm:$0xff]   ;;  %v2071_v34 = vpack.c.bf16 %v123_v19, %v122_v18 }
  0x4f   :  { %2034 = vmatprep.subr.bf16.mxu0 %v2033_v5  ;;  %v2410_v29 = vld [vmem:[#allocation2 + $0x60] ss:$48 sps:$4 sm:$0xff]   ;;  %v503_v31 = vrot.slane %v2408_v26, %v2605_v21  ;;  %v2413_v33 = vld [vmem:[#allocation2 + $0x64] ss:$48 sps:$4 sm:$0xff]   ;;  %v93_v37 = vld [vmem:[#allocation5 + $0x78] sm:$0xff]  ;;  %v2073_v40 = vpack.c.bf16 %v141_v28, %v140_v27  ;;  %v510_v44 = vrot.slane %v2412_v32, %v2605_v21 }
  0x50   :  { %2064 = vmatpush3.bf16.msra.mxu1 %v2063_v4  ;;  %v92_v36 = vld [vmem:[#allocation5 + $0x70] sm:$0xff]  ;;  %v517_v39 = vrot.slane %v2410_v29, %v2605_v21  ;;  %v125_v41 = vld [vmem:[#allocation5 + $0x178] sm:$0xff]  ;;  %v158_v42 = vld [vmem:[#allocation5 + $0x280] sm:$0xff]  ;;  %v524_v45 = vrot.slane %v2413_v33, %v2605_v21 }
  0x51   :  { %2066 = vmatprep.subr.bf16.mxu1 %v2065_v9  ;;  %v124_v38 = vld [vmem:[#allocation5 + $0x170] sm:$0xff]  ;;  %v159_v43 = vld [vmem:[#allocation5 + $0x288] sm:$0xff]  ;;  %v190_v47 = vld [vmem:[#allocation5 + $0x380] sm:$0xff]  ;;  %v2043_v49 = vpack.c.bf16 %v93_v37, %v92_v36 }
  0x52   :  { %2036 = vmatpush3.bf16.msra.mxu0 %v2035_v17  ;;  %v526_v46 = vcombine.high %v503_v31, %v517_v39  ;;  %v191_v48 = vld [vmem:[#allocation5 + $0x388] sm:$0xff]  ;;  %v528_v50 = vcombine.high %v510_v44, %v524_v45  ;;  %v2075_v51 = vpack.c.bf16 %v125_v41, %v124_v38  ;;  %v2077_v52 = vpack.c.bf16 %v159_v43, %v158_v42  ;;  %v142_v53 = vld [vmem:[#allocation5 + $0x200] sm:$0xff]  ;;  %v160_v58 = vld [vmem:[#allocation5 + $0x290] sm:$0xff] }
  0x53   :  { %2038 = vmatprep.subr.bf16.mxu0 %v2037_v23  ;;  %v143_v54 = vld [vmem:[#allocation5 + $0x208] sm:$0xff]  ;;  %v174_v55 = vld [vmem:[#allocation5 + $0x300] sm:$0xff]  ;;  %v2109_v56 = vpack.c.bf16 %v191_v48, %v190_v47  ;;  %v161_v59 = vld [vmem:[#allocation5 + $0x298] sm:$0xff]  ;;  %v525_v60 = vcombine.low %v503_v31, %v517_v39  ;;  %v527_v0 = vcombine.low %v510_v44, %v524_v45 }
  0x54   :  { %2068 = vmatpush3.bf16.msra.mxu1 %v2067_v22  ;;  %797 = vmatprep.mubr.f32.mxu0 %v526_v46  ;;  %v175_v57 = vld [vmem:[#allocation5 + $0x308] sm:$0xff]  ;;  %v192_v61 = vld [vmem:[#allocation5 + $0x390] sm:$0xff]  ;;  %v193_v62 = vld [vmem:[#allocation5 + $0x398] sm:$0xff]  ;;  %v2079_v63 = vpack.c.bf16 %v143_v54, %v142_v53  ;;  %v2081_v2 = vpack.c.bf16 %v161_v59, %v160_v58 }
  0x55   :  { %2070 = vmatprep.subr.bf16.mxu1 %v2069_v25  ;;  %867 = vmatprep.mubr.f32.mxu1 %v528_v50  ;;  %v2111_v1 = vpack.c.bf16 %v175_v57, %v174_v55  ;;  %v144_v3 = vld [vmem:[#allocation5 + $0x210] sm:$0xff]  ;;  %v145_v4 = vld [vmem:[#allocation5 + $0x218] sm:$0xff]  ;;  %v2113_v6 = vpack.c.bf16 %v193_v62, %v192_v61  ;;  %v162_v8 = vld [vmem:[#allocation5 + $0x2a0] sm:$0xff] }
  0x56   :  { %2040 = vmatpush3.bf16.msra.mxu0 %v2039_v30  ;;  %v176_v5 = vld [vmem:[#allocation5 + $0x310] sm:$0xff]  ;;  %v177_v7 = vld [vmem:[#allocation5 + $0x318] sm:$0xff]  ;;  %v163_v9 = vld [vmem:[#allocation5 + $0x2a8] sm:$0xff]  ;;  %v2083_v12 = vpack.c.bf16 %v145_v4, %v144_v3 }
  0x57   :  { %2042 = vmatprep.subr.bf16.mxu0 %v2041_v35  ;;  %v194_v10 = vld [vmem:[#allocation5 + $0x3a0] sm:$0xff]  ;;  %v195_v11 = vld [vmem:[#allocation5 + $0x3a8] sm:$0xff]  ;;  %v2115_v13 = vpack.c.bf16 %v177_v7, %v176_v5  ;;  %v2085_v14 = vpack.c.bf16 %v163_v9, %v162_v8  ;;  %v164_v20 = vld [vmem:[#allocation5 + $0x2b0] sm:$0xff] }
  0x58   :  { %2072 = vmatpush3.bf16.msra.mxu1 %v2071_v34  ;;  %v146_v15 = vld [vmem:[#allocation5 + $0x220] sm:$0xff]  ;;  %v147_v16 = vld [vmem:[#allocation5 + $0x228] sm:$0xff]  ;;  %v2117_v18 = vpack.c.bf16 %v195_v11, %v194_v10  ;;  %v165_v22 = vld [vmem:[#allocation5 + $0x2b8] sm:$0xff] }
  0x59   :  { %2074 = vmatprep.subr.bf16.mxu1 %v2073_v40  ;;  %v178_v17 = vld [vmem:[#allocation5 + $0x320] sm:$0xff]  ;;  %v179_v19 = vld [vmem:[#allocation5 + $0x328] sm:$0xff]  ;;  %v196_v23 = vld [vmem:[#allocation5 + $0x3b0] sm:$0xff]  ;;  %v2087_v25 = vpack.c.bf16 %v147_v16, %v146_v15  ;;  %v2089_v27 = vpack.c.bf16 %v165_v22, %v164_v20 }
  0x5a   :  { %2044 = vmatpush3.bf16.msra.mxu0 %v2043_v49  ;;  %v197_v24 = vld [vmem:[#allocation5 + $0x3b8] sm:$0xff]  ;;  %v2119_v26 = vpack.c.bf16 %v179_v19, %v178_v17  ;;  %v148_v28 = vld [vmem:[#allocation5 + $0x230] sm:$0xff]  ;;  %v166_v33 = vld [vmem:[#allocation5 + $0x2c0] sm:$0xff] }
  0x5b   :  { %2078 = vmatprep.subr.bf16.mxu0 %v2077_v52  ;;  %v149_v29 = vld [vmem:[#allocation5 + $0x238] sm:$0xff]  ;;  %v180_v30 = vld [vmem:[#allocation5 + $0x330] sm:$0xff]  ;;  %v2121_v31 = vpack.c.bf16 %v197_v24, %v196_v23  ;;  %v167_v34 = vld [vmem:[#allocation5 + $0x2c8] sm:$0xff] }
  0x5c   :  { %2076 = vmatpush3.bf16.msra.mxu1 %v2075_v51  ;;  %v181_v32 = vld [vmem:[#allocation5 + $0x338] sm:$0xff]  ;;  %v150_v35 = vld [vmem:[#allocation5 + $0x240] sm:$0xff]  ;;  %v151_v36 = vld [vmem:[#allocation5 + $0x248] sm:$0xff]  ;;  %v2091_v39 = vpack.c.bf16 %v149_v29, %v148_v28  ;;  %v2093_v44 = vpack.c.bf16 %v167_v34, %v166_v33 }
  0x5d   :  { %2110 = vmatprep.subr.bf16.mxu1 %v2109_v56  ;;  %798 = vmatmul.mubr.f32.vlgmr.msra.gmra.mrb[0].mxu0 %v525_v60  ;;  %v198_v37 = vld [vmem:[#allocation5 + $0x3c0] sm:$0xff]  ;;  %v199_v38 = vld [vmem:[#allocation5 + $0x3c8] sm:$0xff]  ;;  %v168_v42 = vld [vmem:[#allocation5 + $0x2d0] sm:$0xff]  ;;  %v2123_v43 = vpack.c.bf16 %v181_v32, %v180_v30  ;;  %v2095_v51 = vpack.c.bf16 %v151_v36, %v150_v35 }
  0x5e   :  { %2080 = vmatpush3.bf16.msra.mxu0 %v2079_v63  ;;  %v182_v40 = vld [vmem:[#allocation5 + $0x340] sm:$0xff]  ;;  %v183_v41 = vld [vmem:[#allocation5 + $0x348] sm:$0xff]  ;;  %v169_v45 = vld [vmem:[#allocation5 + $0x2d8] sm:$0xff]  ;;  %v2125_v46 = vpack.c.bf16 %v199_v38, %v198_v37 }
  0x5f   :  { %868 = vmatmul.mubr.f32.vlgmr.msra.gmra.mrb[0].mxu1 %v527_v0  ;;  %2082 = vmatprep.subr.bf16.mxu0 %v2081_v2  ;;  %v2414_v47 = vld [vmem:[#allocation2 + $0x8] ss:$48 sps:$4 sm:$0xff]   ;;  %v200_v48 = vld [vmem:[#allocation5 + $0x3d0] sm:$0xff]  ;;  %v2418_v53 = vld [vmem:[#allocation2 + $0xc] ss:$48 sps:$4 sm:$0xff]   ;;  %v2127_v55 = vpack.c.bf16 %v183_v41, %v182_v40  ;;  %v2097_v56 = vpack.c.bf16 %v169_v45, %v168_v42 }
  0x60   :  { %2112 = vmatpush3.bf16.msra.mxu1 %v2111_v1  ;;  %v201_v49 = vld [vmem:[#allocation5 + $0x3d8] sm:$0xff]  ;;  %v2612_v52 = vrot.slane %v2414_v47, %v2605_v21  ;;  %v152_v57 = vld [vmem:[#allocation5 + $0x250] sm:$0xff]  ;;  %v170_v63 = vld [vmem:[#allocation5 + $0x2e0] sm:$0xff]  ;;  %v2618_v1 = vrot.slane %v2418_v53, %v2605_v21 }
  0x61   :  { %2114 = vmatprep.subr.bf16.mxu1 %v2113_v6  ;;  %v2416_v50 = vld [vmem:[#allocation2 + $0x68] ss:$48 sps:$4 sm:$0xff]   ;;  %v2419_v54 = vld [vmem:[#allocation2 + $0x6c] ss:$48 sps:$4 sm:$0xff]   ;;  %v184_v59 = vld [vmem:[#allocation5 + $0x350] sm:$0xff]  ;;  %v2129_v61 = vpack.c.bf16 %v201_v49, %v200_v48 }
  0x62   :  { %2084 = vmatpush3.bf16.msra.mxu0 %v2083_v12  ;;  %v153_v58 = vld [vmem:[#allocation5 + $0x258] sm:$0xff]  ;;  %v2615_v60 = vrot.slane %v2416_v50, %v2605_v21  ;;  %v171_v0 = vld [vmem:[#allocation5 + $0x2e8] sm:$0xff]  ;;  %v2621_v2 = vrot.slane %v2419_v54, %v2605_v21  ;;  %v202_v3 = vld [vmem:[#allocation5 + $0x3e0] sm:$0xff] }
  0x63   :  { %2086 = vmatprep.subr.bf16.mxu0 %v2085_v14  ;;  %v185_v62 = vld [vmem:[#allocation5 + $0x358] sm:$0xff]  ;;  %v203_v4 = vld [vmem:[#allocation5 + $0x3e8] sm:$0xff]  ;;  %v2099_v6 = vpack.c.bf16 %v153_v58, %v152_v57  ;;  %v2101_v9 = vpack.c.bf16 %v171_v0, %v170_v63  ;;  %v154_v10 = vld [vmem:[#allocation5 + $0x260] sm:$0xff] }
  0x64   :  { %2116 = vmatpush3.bf16.msra.mxu1 %v2115_v13  ;;  %v562_v5 = vcombine.high %v2612_v52, %v2615_v60  ;;  %v564_v7 = vcombine.high %v2618_v1, %v2621_v2  ;;  %v2131_v8 = vpack.c.bf16 %v185_v62, %v184_v59  ;;  %v155_v11 = vld [vmem:[#allocation5 + $0x268] sm:$0xff]  ;;  %v186_v12 = vld [vmem:[#allocation5 + $0x360] sm:$0xff]  ;;  %v2133_v13 = vpack.c.bf16 %v203_v4, %v202_v3  ;;  %v172_v15 = vld [vmem:[#allocation5 + $0x2f0] sm:$0xff] }
  0x65   :  { %2118 = vmatprep.subr.bf16.mxu1 %v2117_v18  ;;  %v187_v14 = vld [vmem:[#allocation5 + $0x368] sm:$0xff]  ;;  %v173_v16 = vld [vmem:[#allocation5 + $0x2f8] sm:$0xff]  ;;  %v204_v17 = vld [vmem:[#allocation5 + $0x3f0] sm:$0xff]  ;;  %v2103_v19 = vpack.c.bf16 %v155_v11, %v154_v10  ;;  %v561_v42 = vcombine.low %v2612_v52, %v2615_v60 }
  0x66   :  { %2088 = vmatpush3.bf16.msra.mxu0 %v2087_v25  ;;  %937 = vmatprep.mubr.f32.mxu0 %v562_v5  ;;  %v205_v18 = vld [vmem:[#allocation5 + $0x3f8] sm:$0xff]  ;;  %v2135_v20 = vpack.c.bf16 %v187_v14, %v186_v12  ;;  %v2105_v22 = vpack.c.bf16 %v173_v16, %v172_v15  ;;  %v156_v23 = vld [vmem:[#allocation5 + $0x270] sm:$0xff]  ;;  %v222_v28 = vld [vmem:[#allocation5 + $0x480] sm:$0xff] }
  0x67   :  { %2090 = vmatprep.subr.bf16.mxu0 %v2089_v27  ;;  %1007 = vmatprep.mubr.f32.mxu1 %v564_v7  ;;  %v157_v24 = vld [vmem:[#allocation5 + $0x278] sm:$0xff]  ;;  %v188_v25 = vld [vmem:[#allocation5 + $0x370] sm:$0xff]  ;;  %v223_v29 = vld [vmem:[#allocation5 + $0x488] sm:$0xff] }
  0x68   :  { %2120 = vmatpush3.bf16.msra.mxu1 %v2119_v26  ;;  %v2137_v26 = vpack.c.bf16 %v205_v18, %v204_v17  ;;  %v189_v27 = vld [vmem:[#allocation5 + $0x378] sm:$0xff]  ;;  %v254_v30 = vld [vmem:[#allocation5 + $0x580] sm:$0xff]  ;;  %v2107_v32 = vpack.c.bf16 %v157_v24, %v156_v23  ;;  %v2141_v34 = vpack.c.bf16 %v223_v29, %v222_v28  ;;  %v207_v36 = vld [vmem:[#allocation5 + $0x408] sm:$0xff] }
  0x69   :  { %2122 = vmatprep.subr.bf16.mxu1 %v2121_v31  ;;  %v255_v31 = vld [vmem:[#allocation5 + $0x588] sm:$0xff]  ;;  %v2139_v33 = vpack.c.bf16 %v189_v27, %v188_v25  ;;  %v206_v35 = vld [vmem:[#allocation5 + $0x400] sm:$0xff]  ;;  %v224_v40 = vld [vmem:[#allocation5 + $0x490] sm:$0xff] }
  0x6a   :  { %2092 = vmatpush3.bf16.msra.mxu0 %v2091_v39  ;;  %v238_v37 = vld [vmem:[#allocation5 + $0x500] sm:$0xff]  ;;  %v2173_v38 = vpack.c.bf16 %v255_v31, %v254_v30  ;;  %v239_v39 = vld [vmem:[#allocation5 + $0x508] sm:$0xff]  ;;  %v225_v41 = vld [vmem:[#allocation5 + $0x498] sm:$0xff]  ;;  %v2143_v45 = vpack.c.bf16 %v207_v36, %v206_v35 }
  0x6b   :  { %2094 = vmatprep.subr.bf16.mxu0 %v2093_v44  ;;  %v257_v44 = vld [vmem:[#allocation5 + $0x598] sm:$0xff]  ;;  %v2175_v47 = vpack.c.bf16 %v239_v39, %v238_v37  ;;  %v2145_v48 = vpack.c.bf16 %v225_v41, %v224_v40  ;;  %v208_v49 = vld [vmem:[#allocation5 + $0x410] sm:$0xff]  ;;  %v210_v52 = vld [vmem:[#allocation5 + $0x420] sm:$0xff] }
  0x6c   :  { %2124 = vmatpush3.bf16.msra.mxu1 %v2123_v43  ;;  %v256_v43 = vld [vmem:[#allocation5 + $0x590] sm:$0xff]  ;;  %v209_v50 = vld [vmem:[#allocation5 + $0x418] sm:$0xff]  ;;  %v211_v57 = vld [vmem:[#allocation5 + $0x428] sm:$0xff] }
  0x6d   :  { %2126 = vmatprep.subr.bf16.mxu1 %v2125_v46  ;;  %v563_v46 = vcombine.low %v2618_v1, %v2621_v2  ;;  %v2177_v53 = vpack.c.bf16 %v257_v44, %v256_v43  ;;  %v241_v54 = vld [vmem:[#allocation5 + $0x518] sm:$0xff]  ;;  %v258_v58 = vld [vmem:[#allocation5 + $0x5a0] sm:$0xff]  ;;  %v259_v59 = vld [vmem:[#allocation5 + $0x5a8] sm:$0xff]  ;;  %v2147_v60 = vpack.c.bf16 %v209_v50, %v208_v49 }
  0x6e   :  { %2096 = vmatpush3.bf16.msra.mxu0 %v2095_v51  ;;  %v240_v51 = vld [vmem:[#allocation5 + $0x510] sm:$0xff]  ;;  %v243_v62 = vld [vmem:[#allocation5 + $0x528] sm:$0xff]  ;;  %v229_v2 = vld [vmem:[#allocation5 + $0x4b8] sm:$0xff]  ;;  %v2181_v3 = vpack.c.bf16 %v259_v59, %v258_v58 }
  0x6f   :  { %2098 = vmatprep.subr.bf16.mxu0 %v2097_v56  ;;  %v227_v56 = vld [vmem:[#allocation5 + $0x4a8] sm:$0xff]  ;;  %v228_v63 = vld [vmem:[#allocation5 + $0x4b0] sm:$0xff]  ;;  %v2179_v0 = vpack.c.bf16 %v241_v54, %v240_v51  ;;  %v213_v15 = vld [vmem:[#allocation5 + $0x438] sm:$0xff] }
  0x70   :  { %2128 = vmatpush3.bf16.msra.mxu1 %v2127_v55  ;;  %v226_v55 = vld [vmem:[#allocation5 + $0x4a0] sm:$0xff]  ;;  %v260_v5 = vld [vmem:[#allocation5 + $0x5b0] sm:$0xff]  ;;  %v247_v36 = vld [vmem:[#allocation5 + $0x548] sm:$0xff] }
  0x71   :  { %2130 = vmatprep.subr.bf16.mxu1 %v2129_v61  ;;  %v242_v61 = vld [vmem:[#allocation5 + $0x520] sm:$0xff]  ;;  %v2149_v1 = vpack.c.bf16 %v227_v56, %v226_v55  ;;  %v212_v14 = vld [vmem:[#allocation5 + $0x430] sm:$0xff]  ;;  %v265_v40 = vld [vmem:[#allocation5 + $0x5d8] sm:$0xff] }
  0x72   :  { %2100 = vmatpush3.bf16.msra.mxu0 %v2099_v6  ;;  %v2420_v4 = vld [vmem:[#allocation2 + $0x10] ss:$48 sps:$4 sm:$0xff]   ;;  %v261_v6 = vld [vmem:[#allocation5 + $0x5b8] sm:$0xff]  ;;  %v2424_v10 = vld [vmem:[#allocation2 + $0x14] ss:$48 sps:$4 sm:$0xff]   ;;  %v2183_v12 = vpack.c.bf16 %v243_v62, %v242_v61  ;;  %v2155_v28 = vpack.c.bf16 %v213_v15, %v212_v14 }
  0x73   :  { %2102 = vmatprep.subr.bf16.mxu0 %v2101_v9  ;;  %v2422_v7 = vld [vmem:[#allocation2 + $0x70] ss:$48 sps:$4 sm:$0xff]   ;;  %v2632_v9 = vrot.slane %v2420_v4, %v2605_v21  ;;  %v2425_v11 = vld [vmem:[#allocation2 + $0x74] ss:$48 sps:$4 sm:$0xff]   ;;  %v2185_v18 = vpack.c.bf16 %v261_v6, %v260_v5  ;;  %v2638_v23 = vrot.slane %v2424_v10, %v2605_v21  ;;  %v235_v50 = vld [vmem:[#allocation5 + $0x4e8] sm:$0xff] }
  0x74   :  { %2132 = vmatpush3.bf16.msra.mxu1 %v2131_v8  ;;  %v2151_v8 = vpack.c.bf16 %v211_v57, %v210_v52  ;;  %v244_v16 = vld [vmem:[#allocation5 + $0x530] sm:$0xff]  ;;  %v2635_v17 = vrot.slane %v2422_v7, %v2605_v21  ;;  %v2641_v24 = vrot.slane %v2425_v11, %v2605_v21  ;;  %v262_v25 = vld [vmem:[#allocation5 + $0x5c0] sm:$0xff]  ;;  %v219_v57 = vld [vmem:[#allocation5 + $0x468] sm:$0xff] }
  0x75   :  { %2134 = vmatprep.subr.bf16.mxu1 %v2133_v13  ;;  %v2153_v13 = vpack.c.bf16 %v229_v2, %v228_v63  ;;  %v232_v37 = vld [vmem:[#allocation5 + $0x4d0] sm:$0xff]  ;;  %v234_v49 = vld [vmem:[#allocation5 + $0x4e0] sm:$0xff]  ;;  %v237_v62 = vld [vmem:[#allocation5 + $0x4f8] sm:$0xff] }
  0x76   :  { %2104 = vmatpush3.bf16.msra.mxu0 %v2103_v19  ;;  %v245_v19 = vld [vmem:[#allocation5 + $0x538] sm:$0xff]  ;;  %v598_v27 = vcombine.high %v2632_v9, %v2635_v17  ;;  %v600_v29 = vcombine.high %v2638_v23, %v2641_v24  ;;  %v264_v39 = vld [vmem:[#allocation5 + $0x5d0] sm:$0xff]  ;;  %v266_v51 = vld [vmem:[#allocation5 + $0x5e0] sm:$0xff]  ;;  %v2165_v56 = vpack.c.bf16 %v235_v50, %v234_v49 }
  0x77   :  { %2106 = vmatprep.subr.bf16.mxu0 %v2105_v22  ;;  %v231_v22 = vld [vmem:[#allocation5 + $0x4c8] sm:$0xff]  ;;  %v2187_v30 = vpack.c.bf16 %v245_v19, %v244_v16  ;;  %v216_v44 = vld [vmem:[#allocation5 + $0x450] sm:$0xff]  ;;  %v218_v52 = vld [vmem:[#allocation5 + $0x460] sm:$0xff] }
  0x78   :  { %2136 = vmatpush3.bf16.msra.mxu1 %v2135_v20  ;;  %v230_v20 = vld [vmem:[#allocation5 + $0x4c0] sm:$0xff]  ;;  %v236_v61 = vld [vmem:[#allocation5 + $0x4f0] sm:$0xff]  ;;  %v221_v5 = vld [vmem:[#allocation5 + $0x478] sm:$0xff] }
  0x79   :  { %2138 = vmatprep.subr.bf16.mxu1 %v2137_v26  ;;  %v263_v26 = vld [vmem:[#allocation5 + $0x5c8] sm:$0xff]  ;;  %v2157_v31 = vpack.c.bf16 %v231_v22, %v230_v20  ;;  %v250_v58 = vld [vmem:[#allocation5 + $0x560] sm:$0xff]  ;;  %v268_v63 = vld [vmem:[#allocation5 + $0x5f0] sm:$0xff] }
  0x7a   :  { %2108 = vmatpush3.bf16.msra.mxu0 %v2107_v32  ;;  %v214_v32 = vld [vmem:[#allocation5 + $0x440] sm:$0xff]  ;;  %v2189_v35 = vpack.c.bf16 %v263_v26, %v262_v25  ;;  %v220_v4 = vld [vmem:[#allocation5 + $0x470] sm:$0xff]  ;;  %v287_v11 = vld [vmem:[#allocation5 + $0x688] sm:$0xff] }
  0x7b   :  { %2142 = vmatprep.subr.bf16.mxu0 %v2141_v34  ;;  %v246_v34 = vld [vmem:[#allocation5 + $0x540] sm:$0xff]  ;;  %v252_v6 = vld [vmem:[#allocation5 + $0x570] sm:$0xff]  ;;  %v319_v15 = vld [vmem:[#allocation5 + $0x788] sm:$0xff]  ;;  %v2171_v16 = vpack.c.bf16 %v221_v5, %v220_v4 }
  0x7c   :  { %2140 = vmatpush3.bf16.msra.mxu1 %v2139_v33  ;;  %v215_v33 = vld [vmem:[#allocation5 + $0x448] sm:$0xff]  ;;  %v286_v10 = vld [vmem:[#allocation5 + $0x680] sm:$0xff]  ;;  %v288_v20 = vld [vmem:[#allocation5 + $0x690] sm:$0xff] }
  0x7d   :  { %2174 = vmatprep.subr.bf16.mxu1 %v2173_v38  ;;  %938 = vmatmul.mubr.f32.vlgmr.msra.gmra.mrb[2].mxu0 %v561_v42  ;;  %v233_v38 = vld [vmem:[#allocation5 + $0x4d8] sm:$0xff]  ;;  %v2159_v41 = vpack.c.bf16 %v215_v33, %v214_v32  ;;  %v2191_v42 = vpack.c.bf16 %v247_v36, %v246_v34  ;;  %v318_v14 = vld [vmem:[#allocation5 + $0x780] sm:$0xff]  ;;  %v303_v19 = vld [vmem:[#allocation5 + $0x708] sm:$0xff]  ;;  %v2205_v25 = vpack.c.bf16 %v287_v11, %v286_v10 }
  0x7e   :  { %2144 = vmatpush3.bf16.msra.mxu0 %v2143_v45  ;;  %1077 = vmatprep.mubr.f32.mxu0 %v598_v27  ;;  %v2161_v43 = vpack.c.bf16 %v233_v38, %v232_v37  ;;  %v217_v45 = vld [vmem:[#allocation5 + $0x458] sm:$0xff]  ;;  %v2237_v27 = vpack.c.bf16 %v319_v15, %v318_v14  ;;  %v599_v34 = vcombine.low %v2638_v23, %v2641_v24  ;;  %v291_v23 = vld [vmem:[#allocation5 + $0x6a8] sm:$0xff]  ;;  %v278_v14 = vld [vmem:[#allocation5 + $0x640] sm:$0xff] }
  0x7f   :  { %1008 = vmatmul.mubr.f32.vlgmr.msra.gmra.mrb[2].mxu1 %v563_v46  ;;  %2146 = vmatprep.subr.bf16.mxu0 %v2145_v48  ;;  %v248_v46 = vld [vmem:[#allocation5 + $0x550] sm:$0xff]  ;;  %v249_v48 = vld [vmem:[#allocation5 + $0x558] sm:$0xff]  ;;  %v2163_v54 = vpack.c.bf16 %v217_v45, %v216_v44  ;;  %v290_v44 = vld [vmem:[#allocation5 + $0x6a0] sm:$0xff] }
  0x80   :  { %2176 = vmatpush3.bf16.msra.mxu1 %v2175_v47  ;;  %1147 = vmatprep.mubr.f32.mxu1 %v600_v29  ;;  %v2193_v47 = vpack.c.bf16 %v265_v40, %v264_v39  ;;  %v2195_v55 = vpack.c.bf16 %v249_v48, %v248_v46  ;;  %v289_v26 = vld [vmem:[#allocation5 + $0x698] sm:$0xff]  ;;  %v597_v29 = vcombine.low %v2632_v9, %v2635_v17  ;;  %v272_v40 = vld [vmem:[#allocation5 + $0x610] sm:$0xff]  ;;  %v322_v46 = vld [vmem:[#allocation5 + $0x7a0] sm:$0xff] }
  0x81   :  { %2178 = vmatprep.subr.bf16.mxu1 %v2177_v53  ;;  %v267_v53 = vld [vmem:[#allocation5 + $0x5e8] sm:$0xff]  ;;  %v2209_v39 = vpack.c.bf16 %v289_v26, %v288_v20  ;;  %v304_v9 = vld [vmem:[#allocation5 + $0x710] sm:$0xff]  ;;  %v309_v5 = vld [vmem:[#allocation5 + $0x738] sm:$0xff] }
  0x82   :  { %2148 = vmatpush3.bf16.msra.mxu0 %v2147_v60  ;;  %v2197_v59 = vpack.c.bf16 %v267_v53, %v266_v51  ;;  %v251_v60 = vld [vmem:[#allocation5 + $0x568] sm:$0xff]  ;;  %v2213_v53 = vpack.c.bf16 %v291_v23, %v290_v44  ;;  %v296_v20 = vld [vmem:[#allocation5 + $0x6d0] sm:$0xff]  ;;  %v329_v26 = vld [vmem:[#allocation5 + $0x7d8] sm:$0xff] }
  0x83   :  { %2150 = vmatprep.subr.bf16.mxu0 %v2149_v1  ;;  %v2167_v1 = vpack.c.bf16 %v219_v57, %v218_v52  ;;  %v2199_v2 = vpack.c.bf16 %v251_v60, %v250_v58  ;;  %v2428_v32 = vld [vmem:[#allocation2 + $0x78] ss:$48 sps:$4 sm:$0xff]   ;;  %v2430_v36 = vld [vmem:[#allocation2 + $0x1c] ss:$48 sps:$4 sm:$0xff]   ;;  %v292_v58 = vld [vmem:[#allocation5 + $0x6b0] sm:$0xff] }
  0x84   :  { %2180 = vmatpush3.bf16.msra.mxu1 %v2179_v0  ;;  %v269_v0 = vld [vmem:[#allocation5 + $0x5f8] sm:$0xff]  ;;  %v2655_v17 = vrot.slane %v2428_v32, %v2605_v21  ;;  %v2658_v24 = vrot.slane %v2430_v36, %v2605_v21  ;;  %v307_v57 = vld [vmem:[#allocation5 + $0x728] sm:$0xff]  ;;  %v324_v60 = vld [vmem:[#allocation5 + $0x7b0] sm:$0xff] }
  0x85   :  { %2182 = vmatprep.subr.bf16.mxu1 %v2181_v3  ;;  %v2169_v3 = vpack.c.bf16 %v237_v62, %v236_v61  ;;  %v2201_v7 = vpack.c.bf16 %v269_v0, %v268_v63  ;;  %v2431_v37 = vld [vmem:[#allocation2 + $0x7c] ss:$48 sps:$4 sm:$0xff]   ;;  %v312_v32 = vld [vmem:[#allocation5 + $0x750] sm:$0xff]  ;;  %v298_v36 = vld [vmem:[#allocation5 + $0x6e0] sm:$0xff] }
  0x86   :  { %2152 = vmatpush3.bf16.msra.mxu0 %v2151_v8  ;;  %v253_v8 = vld [vmem:[#allocation5 + $0x578] sm:$0xff]  ;;  %v2661_v45 = vrot.slane %v2431_v37, %v2605_v21  ;;  %v327_v10 = vld [vmem:[#allocation5 + $0x7c8] sm:$0xff] }
  0x87   :  { %2154 = vmatprep.subr.bf16.mxu0 %v2153_v13  ;;  %v271_v13 = vld [vmem:[#allocation5 + $0x608] sm:$0xff]  ;;  %v2203_v22 = vpack.c.bf16 %v253_v8, %v252_v6  ;;  %v325_v61 = vld [vmem:[#allocation5 + $0x7b8] sm:$0xff]  ;;  %v294_v6 = vld [vmem:[#allocation5 + $0x6c0] sm:$0xff] }
  0x88   :  { %2184 = vmatpush3.bf16.msra.mxu1 %v2183_v12  ;;  %v270_v12 = vld [vmem:[#allocation5 + $0x600] sm:$0xff]  ;;  %v636_v50 = vcombine.high %v2658_v24, %v2661_v45  ;;  %v2249_v4 = vpack.c.bf16 %v325_v61, %v324_v60  ;;  %v279_v15 = vld [vmem:[#allocation5 + $0x648] sm:$0xff] }
  0x89   :  { %2186 = vmatprep.subr.bf16.mxu1 %v2185_v18  ;;  %v302_v18 = vld [vmem:[#allocation5 + $0x700] sm:$0xff]  ;;  %v2207_v33 = vpack.c.bf16 %v271_v13, %v270_v12  ;;  %v299_v37 = vld [vmem:[#allocation5 + $0x6e8] sm:$0xff] }
  0x8a   :  { %2156 = vmatpush3.bf16.msra.mxu0 %v2155_v28  ;;  %v2426_v28 = vld [vmem:[#allocation2 + $0x18] ss:$48 sps:$4 sm:$0xff]   ;;  %v2239_v38 = vpack.c.bf16 %v303_v19, %v302_v18  ;;  %v326_v8 = vld [vmem:[#allocation5 + $0x7c0] sm:$0xff]  ;;  %v2229_v23 = vpack.c.bf16 %v299_v37, %v298_v36 }
  0x8b   :  { %2158 = vmatprep.subr.bf16.mxu0 %v2157_v31  ;;  %v321_v31 = vld [vmem:[#allocation5 + $0x798] sm:$0xff]  ;;  %v2253_v18 = vpack.c.bf16 %v327_v10, %v326_v8  ;;  %v311_v19 = vld [vmem:[#allocation5 + $0x748] sm:$0xff]  ;;  %v382_v61 = vld [vmem:[#allocation5 + $0x980] sm:$0xff] }
  0x8c   :  { %2188 = vmatpush3.bf16.msra.mxu1 %v2187_v30  ;;  %v320_v30 = vld [vmem:[#allocation5 + $0x790] sm:$0xff]  ;;  %v366_v8 = vld [vmem:[#allocation5 + $0x900] sm:$0xff]  ;;  %v387_v37 = vld [vmem:[#allocation5 + $0x9a8] sm:$0xff] }
  0x8d   :  { %2190 = vmatprep.subr.bf16.mxu1 %v2189_v35  ;;  %v2652_v35 = vrot.slane %v2426_v28, %v2605_v21  ;;  %v386_v36 = vld [vmem:[#allocation5 + $0x9a0] sm:$0xff] }
  0x8e   :  { %2160 = vmatpush3.bf16.msra.mxu0 %v2159_v41  ;;  %v273_v41 = vld [vmem:[#allocation5 + $0x618] sm:$0xff] }
  0x8f   :  { %2162 = vmatprep.subr.bf16.mxu0 %v2161_v43  ;;  %v305_v43 = vld [vmem:[#allocation5 + $0x718] sm:$0xff]  ;;  %v634_v48 = vcombine.high %v2652_v35, %v2655_v17  ;;  %v2211_v49 = vpack.c.bf16 %v273_v41, %v272_v40  ;;  %v331_v40 = vld [vmem:[#allocation5 + $0x7e8] sm:$0xff] }
  0x90   :  { %2192 = vmatpush3.bf16.msra.mxu1 %v2191_v42  ;;  %v2241_v42 = vpack.c.bf16 %v321_v31, %v320_v30  ;;  %v2243_v51 = vpack.c.bf16 %v305_v43, %v304_v9  ;;  %v280_v30 = vld [vmem:[#allocation5 + $0x650] sm:$0xff]  ;;  %v281_v31 = vld [vmem:[#allocation5 + $0x658] sm:$0xff]  ;;  %v283_v9 = vld [vmem:[#allocation5 + $0x668] sm:$0xff] }
  0x91   :  { %2194 = vmatprep.subr.bf16.mxu1 %v2193_v47  ;;  %v323_v47 = vld [vmem:[#allocation5 + $0x7a8] sm:$0xff]  ;;  %v2227_v41 = vpack.c.bf16 %v281_v31, %v280_v30  ;;  %v337_v30 = vld [vmem:[#allocation5 + $0x818] sm:$0xff] }
  0x92   :  { %2164 = vmatpush3.bf16.msra.mxu0 %v2163_v54  ;;  %v274_v54 = vld [vmem:[#allocation5 + $0x620] sm:$0xff]  ;;  %v2245_v52 = vpack.c.bf16 %v323_v47, %v322_v46  ;;  %v315_v43 = vld [vmem:[#allocation5 + $0x768] sm:$0xff]  ;;  %v300_v46 = vld [vmem:[#allocation5 + $0x6f0] sm:$0xff] }
  0x93   :  { %2166 = vmatprep.subr.bf16.mxu0 %v2165_v56  ;;  %v306_v56 = vld [vmem:[#allocation5 + $0x720] sm:$0xff]  ;;  %v369_v31 = vld [vmem:[#allocation5 + $0x918] sm:$0xff] }
  0x94   :  { %2196 = vmatpush3.bf16.msra.mxu1 %v2195_v55  ;;  %v275_v55 = vld [vmem:[#allocation5 + $0x628] sm:$0xff]  ;;  %v2247_v63 = vpack.c.bf16 %v307_v57, %v306_v56  ;;  %v317_v57 = vld [vmem:[#allocation5 + $0x778] sm:$0xff] }
  0x95   :  { %2198 = vmatprep.subr.bf16.mxu1 %v2197_v59  ;;  %v293_v59 = vld [vmem:[#allocation5 + $0x6b8] sm:$0xff]  ;;  %v2215_v62 = vpack.c.bf16 %v275_v55, %v274_v54  ;;  %v316_v55 = vld [vmem:[#allocation5 + $0x770] sm:$0xff] }
  0x96   :  { %2168 = vmatpush3.bf16.msra.mxu0 %v2167_v1  ;;  %v2217_v0 = vpack.c.bf16 %v293_v59, %v292_v58  ;;  %v276_v1 = vld [vmem:[#allocation5 + $0x630] sm:$0xff]  ;;  %v285_v54 = vld [vmem:[#allocation5 + $0x678] sm:$0xff]  ;;  %v350_v58 = vld [vmem:[#allocation5 + $0x880] sm:$0xff] }
  0x97   :  { %2170 = vmatprep.subr.bf16.mxu0 %v2169_v3  ;;  %v308_v3 = vld [vmem:[#allocation5 + $0x730] sm:$0xff]  ;;  %v351_v59 = vld [vmem:[#allocation5 + $0x888] sm:$0xff] }
  0x98   :  { %2200 = vmatpush3.bf16.msra.mxu1 %v2199_v2  ;;  %v277_v2 = vld [vmem:[#allocation5 + $0x638] sm:$0xff]  ;;  %v2251_v12 = vpack.c.bf16 %v309_v5, %v308_v3  ;;  %v2269_v5 = vpack.c.bf16 %v351_v59, %v350_v58  ;;  %v342_v58 = vld [vmem:[#allocation5 + $0x840] sm:$0xff] }
  0x99   :  { %2202 = vmatprep.subr.bf16.mxu1 %v2201_v7  ;;  %v295_v7 = vld [vmem:[#allocation5 + $0x6c8] sm:$0xff]  ;;  %v2219_v11 = vpack.c.bf16 %v277_v2, %v276_v1  ;;  %v2436_v1 = vld [vmem:[#allocation2 + $0x24] ss:$48 sps:$4 sm:$0xff]  }
  0x9a   :  { %2172 = vmatpush3.bf16.msra.mxu0 %v2171_v16  ;;  %v2221_v13 = vpack.c.bf16 %v295_v7, %v294_v6  ;;  %v310_v16 = vld [vmem:[#allocation5 + $0x740] sm:$0xff]  ;;  %v335_v7 = vld [vmem:[#allocation5 + $0x808] sm:$0xff] }
  0x9b   :  { %2206 = vmatprep.subr.bf16.mxu0 %v2205_v25  ;;  %v328_v25 = vld [vmem:[#allocation5 + $0x7d0] sm:$0xff]  ;;  %v2255_v28 = vpack.c.bf16 %v311_v19, %v310_v16  ;;  %v334_v6 = vld [vmem:[#allocation5 + $0x800] sm:$0xff]  ;;  %v633_v16 = vcombine.low %v2652_v35, %v2655_v17  ;;  %v385_v19 = vld [vmem:[#allocation5 + $0x998] sm:$0xff] }
  0x9c   :  { %2204 = vmatpush3.bf16.msra.mxu1 %v2203_v22  ;;  %v297_v22 = vld [vmem:[#allocation5 + $0x6d8] sm:$0xff]  ;;  %v2437_v2 = vld [vmem:[#allocation2 + $0x84] ss:$48 sps:$4 sm:$0xff]  }
  0x9d   :  { %2238 = vmatprep.subr.bf16.mxu1 %v2237_v27  ;;  %1078 = vmatmul.mubr.f32.vlgmr.msra.gmra.mrb[4].mxu0 %v597_v29  ;;  %v2223_v27 = vpack.c.bf16 %v279_v15, %v278_v14  ;;  %v2225_v29 = vpack.c.bf16 %v297_v22, %v296_v20  ;;  %v2676_v20 = vrot.slane %v2436_v1, %v2605_v21  ;;  %v368_v35 = vld [vmem:[#allocation5 + $0x910] sm:$0xff]  ;;  %v390_v59 = vld [vmem:[#allocation5 + $0x9c0] sm:$0xff] }
  0x9e   :  { %2208 = vmatpush3.bf16.msra.mxu0 %v2207_v33  ;;  %1217 = vmatprep.mubr.f32.mxu0 %v634_v48  ;;  %v2257_v33 = vpack.c.bf16 %v329_v26, %v328_v25  ;;  %v301_v48 = vld [vmem:[#allocation5 + $0x6f8] sm:$0xff]  ;;  %v2679_v22 = vrot.slane %v2437_v2, %v2605_v21  ;;  %v2271_v25 = vpack.c.bf16 %v335_v7, %v334_v6  ;;  %v392_v6 = vld [vmem:[#allocation5 + $0x9d0] sm:$0xff] }
  0x9f   :  { %1148 = vmatmul.mubr.f32.vlgmr.msra.gmra.mrb[4].mxu1 %v599_v34  ;;  %2210 = vmatprep.subr.bf16.mxu0 %v2209_v39  ;;  %v313_v34 = vld [vmem:[#allocation5 + $0x758] sm:$0xff]  ;;  %v330_v39 = vld [vmem:[#allocation5 + $0x7e0] sm:$0xff]  ;;  %v635_v26 = vcombine.low %v2658_v24, %v2661_v45 }
  0xa0   :  { %2240 = vmatpush3.bf16.msra.mxu1 %v2239_v38  ;;  %1287 = vmatprep.mubr.f32.mxu1 %v636_v50  ;;  %v282_v38 = vld [vmem:[#allocation5 + $0x660] sm:$0xff]  ;;  %v2259_v44 = vpack.c.bf16 %v313_v34, %v312_v32  ;;  %v2261_v47 = vpack.c.bf16 %v331_v40, %v330_v39  ;;  %v333_v50 = vld [vmem:[#allocation5 + $0x7f8] sm:$0xff]  ;;  %v672_v24 = vcombine.high %v2676_v20, %v2679_v22 }
  0xa1   :  { %2242 = vmatprep.subr.bf16.mxu1 %v2241_v42  ;;  %v314_v42 = vld [vmem:[#allocation5 + $0x760] sm:$0xff]  ;;  %v393_v7 = vld [vmem:[#allocation5 + $0x9d8] sm:$0xff] }
  0xa2   :  { %2212 = vmatpush3.bf16.msra.mxu0 %v2211_v49  ;;  %v332_v49 = vld [vmem:[#allocation5 + $0x7f0] sm:$0xff]  ;;  %v2263_v56 = vpack.c.bf16 %v315_v43, %v314_v42  ;;  %v354_v32 = vld [vmem:[#allocation5 + $0x8a0] sm:$0xff]  ;;  %v2309_v42 = vpack.c.bf16 %v387_v37, %v386_v36  ;;  %v371_v43 = vld [vmem:[#allocation5 + $0x928] sm:$0xff] }
  0xa3   :  { %2214 = vmatprep.subr.bf16.mxu0 %v2213_v53  ;;  %v284_v53 = vld [vmem:[#allocation5 + $0x670] sm:$0xff]  ;;  %v2265_v60 = vpack.c.bf16 %v333_v50, %v332_v49  ;;  %v338_v40 = vld [vmem:[#allocation5 + $0x820] sm:$0xff]  ;;  %v365_v37 = vld [vmem:[#allocation5 + $0x8f8] sm:$0xff] }
  0xa4   :  { %2244 = vmatpush3.bf16.msra.mxu1 %v2243_v51  ;;  %v2231_v51 = vpack.c.bf16 %v283_v9, %v282_v38  ;;  %v2235_v3 = vpack.c.bf16 %v285_v54, %v284_v53  ;;  %v2307_v38 = vpack.c.bf16 %v369_v31, %v368_v35  ;;  %v370_v9 = vld [vmem:[#allocation5 + $0x920] sm:$0xff]  ;;  %v341_v53 = vld [vmem:[#allocation5 + $0x838] sm:$0xff]  ;;  %v372_v54 = vld [vmem:[#allocation5 + $0x930] sm:$0xff] }
  0xa5   :  { %2246 = vmatprep.subr.bf16.mxu1 %v2245_v52  ;;  %v2233_v52 = vpack.c.bf16 %v301_v48, %v300_v46  ;;  %v388_v46 = vld [vmem:[#allocation5 + $0x9b0] sm:$0xff]  ;;  %v2311_v49 = vpack.c.bf16 %v371_v43, %v370_v9  ;;  %v347_v31 = vld [vmem:[#allocation5 + $0x868] sm:$0xff]  ;;  %v381_v43 = vld [vmem:[#allocation5 + $0x978] sm:$0xff] }
  0xa6   :  { %2216 = vmatpush3.bf16.msra.mxu0 %v2215_v62  ;;  %v2432_v62 = vld [vmem:[#allocation2 + $0x20] ss:$48 sps:$4 sm:$0xff]  }
  0xa7   :  { %2218 = vmatprep.subr.bf16.mxu0 %v2217_v0  ;;  %v383_v0 = vld [vmem:[#allocation5 + $0x988] sm:$0xff]  ;;  %v2668_v14 = vrot.slane %v2432_v62, %v2605_v21  ;;  %v364_v36 = vld [vmem:[#allocation5 + $0x8f0] sm:$0xff] }
  0xa8   :  { %2248 = vmatpush3.bf16.msra.mxu1 %v2247_v63  ;;  %v2434_v63 = vld [vmem:[#allocation2 + $0x80] ss:$48 sps:$4 sm:$0xff]   ;;  %v2301_v10 = vpack.c.bf16 %v383_v0, %v382_v61  ;;  %v343_v62 = vld [vmem:[#allocation5 + $0x848] sm:$0xff] }
  0xa9   :  { %2250 = vmatprep.subr.bf16.mxu1 %v2249_v4  ;;  %v2267_v4 = vpack.c.bf16 %v317_v57, %v316_v55  ;;  %v2671_v15 = vrot.slane %v2434_v63, %v2605_v21  ;;  %v359_v57 = vld [vmem:[#allocation5 + $0x8c8] sm:$0xff]  ;;  %v374_v63 = vld [vmem:[#allocation5 + $0x940] sm:$0xff] }
  0xaa   :  { %2220 = vmatpush3.bf16.msra.mxu0 %v2219_v11  ;;  %v367_v11 = vld [vmem:[#allocation5 + $0x908] sm:$0xff] }
  0xab   :  { %2222 = vmatprep.subr.bf16.mxu0 %v2221_v13  ;;  %v353_v13 = vld [vmem:[#allocation5 + $0x898] sm:$0xff]  ;;  %v670_v34 = vcombine.high %v2668_v14, %v2671_v15  ;;  %v375_v0 = vld [vmem:[#allocation5 + $0x948] sm:$0xff] }
  0xac   :  { %2252 = vmatpush3.bf16.msra.mxu1 %v2251_v12  ;;  %v352_v12 = vld [vmem:[#allocation5 + $0x890] sm:$0xff] }
  0xad   :  { %2254 = vmatprep.subr.bf16.mxu1 %v2253_v18  ;;  %v384_v18 = vld [vmem:[#allocation5 + $0x990] sm:$0xff] }
  0xae   :  { %2224 = vmatpush3.bf16.msra.mxu0 %v2223_v27  ;;  %v2303_v27 = vpack.c.bf16 %v367_v11, %v366_v8  ;;  %v2305_v17 = vpack.c.bf16 %v385_v19, %v384_v18  ;;  %v2287_v8 = vpack.c.bf16 %v343_v62, %v342_v58  ;;  %v2321_v18 = vpack.c.bf16 %v393_v7, %v392_v6  ;;  %v377_v19 = vld [vmem:[#allocation5 + $0x958] sm:$0xff]  ;;  %v430_v58 = vld [vmem:[#allocation5 + $0xb00] sm:$0xff] }
  0xaf   :  { %2226 = vmatprep.subr.bf16.mxu0 %v2225_v29  ;;  %v336_v29 = vld [vmem:[#allocation5 + $0x810] sm:$0xff]  ;;  %v417_v62 = vld [vmem:[#allocation5 + $0xa98] sm:$0xff]  ;;  %v671_v7 = vcombine.low %v2676_v20, %v2679_v22 }
  0xb0   :  { %2256 = vmatpush3.bf16.msra.mxu1 %v2255_v28  ;;  %v2273_v28 = vpack.c.bf16 %v353_v13, %v352_v12  ;;  %v2275_v45 = vpack.c.bf16 %v337_v30, %v336_v29  ;;  %v344_v12 = vld [vmem:[#allocation5 + $0x850] sm:$0xff]  ;;  %v345_v13 = vld [vmem:[#allocation5 + $0x858] sm:$0xff] }
  0xb1   :  { %2258 = vmatprep.subr.bf16.mxu1 %v2257_v33  ;;  %v355_v33 = vld [vmem:[#allocation5 + $0x8a8] sm:$0xff]  ;;  %v2291_v29 = vpack.c.bf16 %v345_v13, %v344_v12  ;;  %v401_v12 = vld [vmem:[#allocation5 + $0xa18] sm:$0xff] }
  0xb2   :  { %2228 = vmatpush3.bf16.msra.mxu0 %v2227_v41  ;;  %v2277_v39 = vpack.c.bf16 %v355_v33, %v354_v32  ;;  %v339_v41 = vld [vmem:[#allocation5 + $0x828] sm:$0xff]  ;;  %v378_v32 = vld [vmem:[#allocation5 + $0x960] sm:$0xff]  ;;  %v433_v13 = vld [vmem:[#allocation5 + $0xb18] sm:$0xff] }
  0xb3   :  { %2230 = vmatprep.subr.bf16.mxu0 %v2229_v23  ;;  %v357_v23 = vld [vmem:[#allocation5 + $0x8b8] sm:$0xff]  ;;  %v2279_v48 = vpack.c.bf16 %v339_v41, %v338_v40  ;;  %v380_v41 = vld [vmem:[#allocation5 + $0x970] sm:$0xff] }
  0xb4   :  { %2260 = vmatpush3.bf16.msra.mxu1 %v2259_v44  ;;  %v356_v44 = vld [vmem:[#allocation5 + $0x8b0] sm:$0xff]  ;;  %v349_v40 = vld [vmem:[#allocation5 + $0x878] sm:$0xff] }
  0xb5   :  { %2262 = vmatprep.subr.bf16.mxu1 %v2261_v47  ;;  %v389_v47 = vld [vmem:[#allocation5 + $0x9b8] sm:$0xff]  ;;  %v2281_v50 = vpack.c.bf16 %v357_v23, %v356_v44  ;;  %v414_v44 = vld [vmem:[#allocation5 + $0xa80] sm:$0xff]  ;;  %v415_v23 = vld [vmem:[#allocation5 + $0xa88] sm:$0xff] }
  0xb6   :  { %2232 = vmatpush3.bf16.msra.mxu0 %v2231_v51  ;;  %v340_v51 = vld [vmem:[#allocation5 + $0x830] sm:$0xff]  ;;  %v2313_v55 = vpack.c.bf16 %v389_v47, %v388_v46  ;;  %v446_v47 = vld [vmem:[#allocation5 + $0xb80] sm:$0xff] }
  0xb7   :  { %2234 = vmatprep.subr.bf16.mxu0 %v2233_v52  ;;  %v358_v52 = vld [vmem:[#allocation5 + $0x8c0] sm:$0xff]  ;;  %v2283_v61 = vpack.c.bf16 %v341_v53, %v340_v51  ;;  %v2442_v51 = vld [vmem:[#allocation2 + $0x2c] ss:$48 sps:$4 sm:$0xff]  }
  0xb8   :  { %2264 = vmatpush3.bf16.msra.mxu1 %v2263_v56  ;;  %v373_v56 = vld [vmem:[#allocation5 + $0x938] sm:$0xff]  ;;  %v2285_v2 = vpack.c.bf16 %v359_v57, %v358_v52  ;;  %v398_v52 = vld [vmem:[#allocation5 + $0xa00] sm:$0xff]  ;;  %v399_v57 = vld [vmem:[#allocation5 + $0xa08] sm:$0xff] }
  0xb9   :  { %2266 = vmatprep.subr.bf16.mxu1 %v2265_v60  ;;  %v391_v60 = vld [vmem:[#allocation5 + $0x9c8] sm:$0xff]  ;;  %v2315_v1 = vpack.c.bf16 %v373_v56, %v372_v54  ;;  %v2333_v56 = vpack.c.bf16 %v415_v23, %v414_v44  ;;  %v2335_v6 = vpack.c.bf16 %v399_v57, %v398_v52  ;;  %v457_v52 = vld [vmem:[#allocation5 + $0xbd8] sm:$0xff] }
  0xba   :  { %2236 = vmatpush3.bf16.msra.mxu0 %v2235_v3  ;;  %v360_v3 = vld [vmem:[#allocation5 + $0x8d0] sm:$0xff]  ;;  %v2443_v53 = vld [vmem:[#allocation2 + $0x8c] ss:$48 sps:$4 sm:$0xff]  }
  0xbb   :  { %2270 = vmatprep.subr.bf16.mxu0 %v2269_v5  ;;  %v361_v5 = vld [vmem:[#allocation5 + $0x8d8] sm:$0xff]  ;;  %v455_v44 = vld [vmem:[#allocation5 + $0xbc8] sm:$0xff] }
  0xbc   :  { %2268 = vmatpush3.bf16.msra.mxu1 %v2267_v4  ;;  %v2317_v4 = vpack.c.bf16 %v391_v60, %v390_v59  ;;  %v2289_v11 = vpack.c.bf16 %v361_v5, %v360_v3  ;;  %v431_v60 = vld [vmem:[#allocation5 + $0xb08] sm:$0xff]  ;;  %v449_v3 = vld [vmem:[#allocation5 + $0xb98] sm:$0xff]  ;;  %v2699_v5 = vrot.slane %v2443_v53, %v2605_v21 }
  0xbd   :  { %2302 = vmatprep.subr.bf16.mxu1 %v2301_v10  ;;  %1218 = vmatmul.mubr.f32.vlgmr.msra.gmra.mrb[6].mxu0 %v633_v16  ;;  %v2319_v10 = vpack.c.bf16 %v375_v0, %v374_v63  ;;  %v376_v16 = vld [vmem:[#allocation5 + $0x950] sm:$0xff]  ;;  %v439_v53 = vld [vmem:[#allocation5 + $0xb48] sm:$0xff] }
  0xbe   :  { %2272 = vmatpush3.bf16.msra.mxu0 %v2271_v25  ;;  %1357 = vmatprep.mubr.f32.mxu0 %v670_v34  ;;  %v362_v25 = vld [vmem:[#allocation5 + $0x8e0] sm:$0xff]  ;;  %v2323_v30 = vpack.c.bf16 %v377_v19, %v376_v16  ;;  %v379_v34 = vld [vmem:[#allocation5 + $0x968] sm:$0xff] }
  0xbf   :  { %1288 = vmatmul.mubr.f32.vlgmr.msra.gmra.mrb[6].mxu1 %v635_v26  ;;  %2274 = vmatprep.subr.bf16.mxu0 %v2273_v28  ;;  %v363_v26 = vld [vmem:[#allocation5 + $0x8e8] sm:$0xff]  ;;  %v2327_v9 = vpack.c.bf16 %v379_v34, %v378_v32  ;;  %v418_v16 = vld [vmem:[#allocation5 + $0xaa0] sm:$0xff]  ;;  %v421_v32 = vld [vmem:[#allocation5 + $0xab8] sm:$0xff] }
  0xc0   :  { %2304 = vmatpush3.bf16.msra.mxu1 %v2303_v27  ;;  %1427 = vmatprep.mubr.f32.mxu1 %v672_v24  ;;  %v394_v27 = vld [vmem:[#allocation5 + $0x9e0] sm:$0xff]  ;;  %v395_v28 = vld [vmem:[#allocation5 + $0x9e8] sm:$0xff]  ;;  %v2293_v35 = vpack.c.bf16 %v363_v26, %v362_v25  ;;  %v396_v24 = vld [vmem:[#allocation5 + $0x9f0] sm:$0xff] }
  0xc1   :  { %2306 = vmatprep.subr.bf16.mxu1 %v2305_v17  ;;  %v346_v17 = vld [vmem:[#allocation5 + $0x860] sm:$0xff]  ;;  %v2325_v33 = vpack.c.bf16 %v395_v28, %v394_v27  ;;  %v451_v25 = vld [vmem:[#allocation5 + $0xba8] sm:$0xff]  ;;  %v453_v34 = vld [vmem:[#allocation5 + $0xbb8] sm:$0xff] }
  0xc2   :  { %2276 = vmatpush3.bf16.msra.mxu0 %v2275_v45  ;;  %v397_v45 = vld [vmem:[#allocation5 + $0x9f8] sm:$0xff]  ;;  %v450_v19 = vld [vmem:[#allocation5 + $0xba0] sm:$0xff] }
  0xc3   :  { %2278 = vmatprep.subr.bf16.mxu0 %v2277_v39  ;;  %v348_v39 = vld [vmem:[#allocation5 + $0x870] sm:$0xff]  ;;  %v2329_v46 = vpack.c.bf16 %v397_v45, %v396_v24  ;;  %v402_v28 = vld [vmem:[#allocation5 + $0xa20] sm:$0xff] }
  0xc4   :  { %2308 = vmatpush3.bf16.msra.mxu1 %v2307_v38  ;;  %v2295_v38 = vpack.c.bf16 %v347_v31, %v346_v17  ;;  %v2299_v54 = vpack.c.bf16 %v349_v40, %v348_v39  ;;  %v435_v17 = vld [vmem:[#allocation5 + $0xb28] sm:$0xff]  ;;  %v420_v31 = vld [vmem:[#allocation5 + $0xab0] sm:$0xff] }
  0xc5   :  { %2310 = vmatprep.subr.bf16.mxu1 %v2309_v42  ;;  %v2297_v42 = vpack.c.bf16 %v365_v37, %v364_v36  ;;  %v2345_v24 = vpack.c.bf16 %v421_v32, %v420_v31  ;;  %v404_v45 = vld [vmem:[#allocation5 + $0xa30] sm:$0xff] }
  0xc6   :  { %2280 = vmatpush3.bf16.msra.mxu0 %v2279_v48  ;;  %v2438_v48 = vld [vmem:[#allocation2 + $0x28] ss:$48 sps:$4 sm:$0xff]   ;;  %v436_v39 = vld [vmem:[#allocation5 + $0xb30] sm:$0xff] }
  0xc7   :  { %2282 = vmatprep.subr.bf16.mxu0 %v2281_v50  ;;  %v447_v50 = vld [vmem:[#allocation5 + $0xb88] sm:$0xff]  ;;  %v2688_v63 = vrot.slane %v2438_v48, %v2605_v21  ;;  %v406_v48 = vld [vmem:[#allocation5 + $0xa40] sm:$0xff] }
  0xc8   :  { %2312 = vmatpush3.bf16.msra.mxu1 %v2311_v49  ;;  %v2440_v49 = vld [vmem:[#allocation2 + $0x88] ss:$48 sps:$4 sm:$0xff]   ;;  %v2365_v59 = vpack.c.bf16 %v447_v50, %v446_v47  ;;  %v438_v50 = vld [vmem:[#allocation5 + $0xb40] sm:$0xff] }
  0xc9   :  { %2314 = vmatprep.subr.bf16.mxu1 %v2313_v55  ;;  %v2331_v55 = vpack.c.bf16 %v381_v43, %v380_v41  ;;  %v2691_v0 = vrot.slane %v2440_v49, %v2605_v21  ;;  %v437_v41 = vld [vmem:[#allocation5 + $0xb38] sm:$0xff]  ;;  %v454_v43 = vld [vmem:[#allocation5 + $0xbc0] sm:$0xff]  ;;  %v407_v49 = vld [vmem:[#allocation5 + $0xa48] sm:$0xff] }
  0xca   :  { %2284 = vmatpush3.bf16.msra.mxu0 %v2283_v61  ;;  %v416_v61 = vld [vmem:[#allocation5 + $0xa90] sm:$0xff]  ;;  %v2351_v57 = vpack.c.bf16 %v407_v49, %v406_v48 }
  0xcb   :  { %2286 = vmatprep.subr.bf16.mxu0 %v2285_v2  ;;  %v448_v2 = vld [vmem:[#allocation5 + $0xb90] sm:$0xff] }
  0xcc   :  { %2316 = vmatpush3.bf16.msra.mxu1 %v2315_v1  ;;  %v669_v1 = vcombine.low %v2668_v14, %v2671_v15  ;;  %v432_v14 = vld [vmem:[#allocation5 + $0xb10] sm:$0xff]  ;;  %v2369_v15 = vpack.c.bf16 %v449_v3, %v448_v2  ;;  %v441_v2 = vld [vmem:[#allocation5 + $0xb58] sm:$0xff]  ;;  %v426_v3 = vld [vmem:[#allocation5 + $0xae0] sm:$0xff] }
  0xcd   :  { %2318 = vmatprep.subr.bf16.mxu1 %v2317_v4  ;;  %v2696_v4 = vrot.slane %v2442_v51, %v2605_v21  ;;  %v706_v21 = vcombine.high %v2688_v63, %v2691_v0  ;;  %v2371_v26 = vpack.c.bf16 %v433_v13, %v432_v14  ;;  %v2381_v51 = vpack.c.bf16 %v455_v44, %v454_v43  ;;  %v410_v14 = vld [vmem:[#allocation5 + $0xa60] sm:$0xff] }
  0xce   :  { %2288 = vmatpush3.bf16.msra.mxu0 %v2287_v8  ;;  %v2367_v8 = vpack.c.bf16 %v431_v60, %v430_v58  ;;  %v2383_v58 = vpack.c.bf16 %v439_v53, %v438_v50  ;;  %v408_v60 = vld [vmem:[#allocation5 + $0xa50] sm:$0xff]  ;;  %v442_v13 = vld [vmem:[#allocation5 + $0xb60] sm:$0xff] }
  0xcf   :  { %2290 = vmatprep.subr.bf16.mxu0 %v2289_v11  ;;  %v400_v11 = vld [vmem:[#allocation5 + $0xa10] sm:$0xff]  ;;  %v708_v20 = vcombine.high %v2696_v4, %v2699_v5 }
  0xd0   :  { %2320 = vmatpush3.bf16.msra.mxu1 %v2319_v10  ;;  %v2337_v10 = vpack.c.bf16 %v417_v62, %v416_v61  ;;  %v2339_v22 = vpack.c.bf16 %v401_v12, %v400_v11  ;;  %v409_v61 = vld [vmem:[#allocation5 + $0xa58] sm:$0xff]  ;;  %v440_v62 = vld [vmem:[#allocation5 + $0xb50] sm:$0xff] }
  0xd1   :  { %2322 = vmatprep.subr.bf16.mxu1 %v2321_v18  ;;  %v419_v18 = vld [vmem:[#allocation5 + $0xaa8] sm:$0xff]  ;;  %v2387_v11 = vpack.c.bf16 %v441_v2, %v440_v62 }
  0xd2   :  { %2292 = vmatpush3.bf16.msra.mxu0 %v2291_v29  ;;  %v2341_v27 = vpack.c.bf16 %v419_v18, %v418_v16  ;;  %v403_v29 = vld [vmem:[#allocation5 + $0xa28] sm:$0xff] }
  0xd3   :  { %2294 = vmatprep.subr.bf16.mxu0 %v2293_v35  ;;  %v2373_v35 = vpack.c.bf16 %v451_v25, %v450_v19  ;;  %v2343_v36 = vpack.c.bf16 %v403_v29, %v402_v28  ;;  %v443_v18 = vld [vmem:[#allocation5 + $0xb68] sm:$0xff]  ;;  %v429_v19 = vld [vmem:[#allocation5 + $0xaf8] sm:$0xff]  ;;  %v460_v25 = vld [vmem:[#allocation5 + $0xbf0] sm:$0xff] }
  0xd4   :  { %2324 = vmatpush3.bf16.msra.mxu1 %v2323_v30  ;;  %v434_v30 = vld [vmem:[#allocation5 + $0xb20] sm:$0xff]  ;;  %v412_v28 = vld [vmem:[#allocation5 + $0xa70] sm:$0xff]  ;;  %v413_v29 = vld [vmem:[#allocation5 + $0xa78] sm:$0xff] }
  0xd5   :  { %2326 = vmatprep.subr.bf16.mxu1 %v2325_v33  ;;  %v452_v33 = vld [vmem:[#allocation5 + $0xbb0] sm:$0xff]  ;;  %v2375_v37 = vpack.c.bf16 %v435_v17, %v434_v30  ;;  %v445_v17 = vld [vmem:[#allocation5 + $0xb78] sm:$0xff]  ;;  %v2363_v31 = vpack.c.bf16 %v413_v29, %v412_v28 }
  0xd6   :  { %2296 = vmatpush3.bf16.msra.mxu0 %v2295_v38  ;;  %v405_v38 = vld [vmem:[#allocation5 + $0xa38] sm:$0xff]  ;;  %v2377_v40 = vpack.c.bf16 %v453_v34, %v452_v33  ;;  %v705_v33 = vcombine.low %v2688_v63, %v2691_v0  ;;  %v707_v34 = vcombine.low %v2696_v4, %v2699_v5 }
  0xd7   :  { %2298 = vmatprep.subr.bf16.mxu0 %v2297_v42  ;;  %v423_v42 = vld [vmem:[#allocation5 + $0xac8] sm:$0xff]  ;;  %v2347_v23 = vpack.c.bf16 %v405_v38, %v404_v45 }
  0xd8   :  { %2328 = vmatpush3.bf16.msra.mxu1 %v2327_v9  ;;  %v422_v9 = vld [vmem:[#allocation5 + $0xac0] sm:$0xff] }
  0xd9   :  { %2330 = vmatprep.subr.bf16.mxu1 %v2329_v46  ;;  %v2379_v46 = vpack.c.bf16 %v437_v41, %v436_v39  ;;  %v2349_v47 = vpack.c.bf16 %v423_v42, %v422_v9 }
  0xda   :  { %2300 = vmatpush3.bf16.msra.mxu0 %v2299_v54  ;;  %v424_v54 = vld [vmem:[#allocation5 + $0xad0] sm:$0xff] }
  0xdb   :  { %2334 = vmatprep.subr.bf16.mxu0 %v2333_v56  ;;  %v456_v56 = vld [vmem:[#allocation5 + $0xbd0] sm:$0xff] }
  0xdc   :  { %2332 = vmatpush3.bf16.msra.mxu1 %v2331_v55  ;;  %v425_v55 = vld [vmem:[#allocation5 + $0xad8] sm:$0xff] }
  0xdd   :  { %2366 = vmatprep.subr.bf16.mxu1 %v2365_v59  ;;  %1358 = vmatmul.mubr.f32.vlgmr.msra.gmra.mrb[8].mxu0 %v669_v1  ;;  %v2353_v59 = vpack.c.bf16 %v425_v55, %v424_v54  ;;  %v2385_v1 = vpack.c.bf16 %v457_v52, %v456_v56 }
  0xde   :  { %2336 = vmatpush3.bf16.msra.mxu0 %v2335_v6  ;;  %1497 = vmatprep.mubr.f32.mxu0 %v706_v21  ;;  %v427_v6 = vld [vmem:[#allocation5 + $0xae8] sm:$0xff]  ;;  %v428_v21 = vld [vmem:[#allocation5 + $0xaf0] sm:$0xff] }
  0xdf   :  { %1428 = vmatmul.mubr.f32.vlgmr.msra.gmra.mrb[8].mxu1 %v671_v7  ;;  %2338 = vmatprep.subr.bf16.mxu0 %v2337_v10  ;;  %v458_v7 = vld [vmem:[#allocation5 + $0xbe0] sm:$0xff]  ;;  %v2355_v10 = vpack.c.bf16 %v409_v61, %v408_v60  ;;  %v2357_v12 = vpack.c.bf16 %v427_v6, %v426_v3 }
  0xe0   :  { %2368 = vmatpush3.bf16.msra.mxu1 %v2367_v8  ;;  %1567 = vmatprep.mubr.f32.mxu1 %v708_v20  ;;  %v459_v8 = vld [vmem:[#allocation5 + $0xbe8] sm:$0xff]  ;;  %v461_v20 = vld [vmem:[#allocation5 + $0xbf8] sm:$0xff] }
  0xe1   :  { %2370 = vmatprep.subr.bf16.mxu1 %v2369_v15  ;;  %v411_v15 = vld [vmem:[#allocation5 + $0xa68] sm:$0xff]  ;;  %v2389_v16 = vpack.c.bf16 %v459_v8, %v458_v7  ;;  %v2393_v30 = vpack.c.bf16 %v461_v20, %v460_v25 }
  0xe2   :  { %2340 = vmatpush3.bf16.msra.mxu0 %v2339_v22  ;;  %v2359_v22 = vpack.c.bf16 %v411_v15, %v410_v14 }
  0xe3   :  { %2342 = vmatprep.subr.bf16.mxu0 %v2341_v27  ;;  %v2361_v27 = vpack.c.bf16 %v429_v19, %v428_v21 }
  0xe4   :  { %2372 = vmatpush3.bf16.msra.mxu1 %v2371_v26  ;;  %v2391_v26 = vpack.c.bf16 %v443_v18, %v442_v13 }
  0xe5   :  { %2374 = vmatprep.subr.bf16.mxu1 %v2373_v35  ;;  %v444_v35 = vld [vmem:[#allocation5 + $0xb70] sm:$0xff] }
  0xe6   :  { %2344 = vmatpush3.bf16.msra.mxu0 %v2343_v36  ;;  %v2395_v32 = vpack.c.bf16 %v445_v17, %v444_v35 }
  0xe7   :  { %2346 = vmatprep.subr.bf16.mxu0 %v2345_v24 }
  0xe8   :  { %2376 = vmatpush3.bf16.msra.mxu1 %v2375_v37  ;;  %v1592_v37 = vld [vmem:[#allocation7] ss:$0 sm:$0xff] }
  0xe9   :  { %2378 = vmatprep.subr.bf16.mxu1 %v2377_v40 }
  0xea   :  { %2348 = vmatpush3.bf16.msra.mxu0 %v2347_v23 }
  0xeb   :  { %2350 = vmatprep.subr.bf16.mxu0 %v2349_v47 }
  0xec   :  { %2380 = vmatpush3.bf16.msra.mxu1 %v2379_v46 }
  0xed   :  { %2382 = vmatprep.subr.bf16.mxu1 %v2381_v51 }
  0xee   :  { %2352 = vmatpush3.bf16.msra.mxu0 %v2351_v57 }
  0xef   :  { %2354 = vmatprep.subr.bf16.mxu0 %v2353_v59 }
  0xf0   :  { %2384 = vmatpush3.bf16.msra.mxu1 %v2383_v58 }
  0xf1   :  { %2386 = vmatprep.subr.bf16.mxu1 %v2385_v1 }
  0xf2   :  { %2356 = vmatpush3.bf16.msra.mxu0 %v2355_v10 }
  0xf3   :  { %2358 = vmatprep.subr.bf16.mxu0 %v2357_v12 }
  0xf4   :  { %2388 = vmatpush3.bf16.msra.mxu1 %v2387_v11 }
  0xf5   :  { %2390 = vmatprep.subr.bf16.mxu1 %v2389_v16 }
  0xf6   :  { %2360 = vmatpush3.bf16.msra.mxu0 %v2359_v22 }
  0xf7   :  { %2362 = vmatprep.subr.bf16.mxu0 %v2361_v27 }
  0xf8   :  { %2392 = vmatpush3.bf16.msra.mxu1 %v2391_v26 }
  0xf9   :  { %2394 = vmatprep.subr.bf16.mxu1 %v2393_v30 }
  0xfa   :  { %2364 = vmatpush3.bf16.msra.mxu0 %v2363_v31 }
  0xfc   :  { %2396 = vmatpush3.bf16.msra.mxu1 %v2395_v32 }
  0xfd   :  { %1498 = vmatmul.mubr.f32.vlgmr.msra.gmra.mrb[10].mxu0 %v705_v33 }
  0xff   :  { %1568 = vmatmul.mubr.f32.vlgmr.msra.gmra.mrb[10].mxu1 %v707_v34 }
 0x130   :  { %v1625_v36 = vpop.f32.mrb[0].mxu0 }
 0x131   :  { %v1626_v24 = vpop.f32.mrb[1].mxu0 }
 0x132   :  { %v1660_v45 = vpop.f32.mrb[0].mxu1  ;;  %v1627_v38 = vadd.f32 %v1626_v24, %v1625_v36 }
 0x133   :  { %v1661_v39 = vpop.f32.mrb[1].mxu1 }
 0x134   :  { %v1662_v40 = vadd.f32 %v1661_v39, %v1660_v45  ;;  %v800_v41 = vadd.f32 %v1627_v38, %v1592_v37 }
 0x136   :  { %v870_v9 = vadd.f32 %v1662_v40, %v800_v41 }
 0x150   :  { %v1695_v42 = vpop.f32.mrb[2].mxu0 }
 0x151   :  { %v1696_v43 = vpop.f32.mrb[3].mxu0 }
 0x152   :  { %v1730_v44 = vpop.f32.mrb[2].mxu1  ;;  %v1697_v63 = vadd.f32 %v1696_v43, %v1695_v42 }
 0x153   :  { %v1731_v0 = vpop.f32.mrb[3].mxu1 }
 0x154   :  { %v1732_v23 = vadd.f32 %v1731_v0, %v1730_v44  ;;  %v940_v46 = vadd.f32 %v1697_v63, %v870_v9 }
 0x156   :  { %v1010_v4 = vadd.f32 %v1732_v23, %v940_v46 }
 0x170   :  { %v1765_v5 = vpop.f32.mrb[4].mxu0 }
 0x171   :  { %v1766_v47 = vpop.f32.mrb[5].mxu0 }
 0x172   :  { %v1800_v48 = vpop.f32.mrb[4].mxu1  ;;  %v1767_v49 = vadd.f32 %v1766_v47, %v1765_v5 }
 0x173   :  { %v1801_v50 = vpop.f32.mrb[5].mxu1 }
 0x174   :  { %v1802_v51 = vadd.f32 %v1801_v50, %v1800_v48  ;;  %v1080_v53 = vadd.f32 %v1767_v49, %v1010_v4 }
 0x176   :  { %v1150_v54 = vadd.f32 %v1802_v51, %v1080_v53 }
 0x190   :  { %v1835_v55 = vpop.f32.mrb[6].mxu0 }
 0x191   :  { %v1836_v56 = vpop.f32.mrb[7].mxu0 }
 0x192   :  { %v1870_v52 = vpop.f32.mrb[6].mxu1  ;;  %v1837_v57 = vadd.f32 %v1836_v56, %v1835_v55 }
 0x193   :  { %v1871_v58 = vpop.f32.mrb[7].mxu1 }
 0x194   :  { %v1872_v59 = vadd.f32 %v1871_v58, %v1870_v52  ;;  %v1220_v60 = vadd.f32 %v1837_v57, %v1150_v54 }
 0x196   :  { %v1290_v61 = vadd.f32 %v1872_v59, %v1220_v60 }
 0x1b0   :  { %v1905_v62 = vpop.f32.mrb[8].mxu0 }
 0x1b1   :  { %v1906_v1 = vpop.f32.mrb[9].mxu0 }
 0x1b2   :  { %v1940_v2 = vpop.f32.mrb[8].mxu1  ;;  %v1907_v3 = vadd.f32 %v1906_v1, %v1905_v62 }
 0x1b3   :  { %v1941_v6 = vpop.f32.mrb[9].mxu1 }
 0x1b4   :  { %v1942_v7 = vadd.f32 %v1941_v6, %v1940_v2  ;;  %v1360_v8 = vadd.f32 %v1907_v3, %v1290_v61 }
 0x1b6   :  { %v1430_v10 = vadd.f32 %v1942_v7, %v1360_v8 }
 0x1d0   :  { %v1975_v11 = vpop.f32.mrb[10].mxu0 }
 0x1d1   :  { %v1976_v12 = vpop.f32.mrb[11].mxu0 }
 0x1d2   :  { %v2010_v14 = vpop.f32.mrb[10].mxu1  ;;  %v1977_v15 = vadd.f32 %v1976_v12, %v1975_v11 }
 0x1d3   :  { %v2011_v13 = vpop.f32.mrb[11].mxu1 }
 0x1d4   :  { %v2012_v16 = vadd.f32 %v2011_v13, %v2010_v14  ;;  %v1500_v18 = vadd.f32 %v1977_v15, %v1430_v10 }
 0x1d6   :  { %v1570_v21 = vadd.f32 %v2012_v16, %v1500_v18 }
 0x1d8   :  { %1573 = vst [vmem:[#allocation8] sm:$0xff] %v1570_v21 }
 0x1d9   :  { %1578 = vsyncadd [#allocation4], 96  ;;  %s2546_s2 = smov [#allocation8]  }
 0x1da   :  { %s1579_s25 = sshll.u32 %s2546_s2, 4  ;;  %s1580_s25 = int_to_ptr.vmem [resolvable:$true] %s1579_s25 }
 0x1db   :  { %s2510_s26 = scalar_lea.vmem %s1580_s25, 32  ;;  %s2514_s27 = scalar_lea.vmem %s1580_s25, 128 }
 0x1dc   :  { %p2511_p10 = scmp.ne.s32.totalorder %s1580_s25, %s2510_s26  ;;  %p2515_p11 = scmp.lt.s32.totalorder %s1580_s25, %s1580_s25 }
 0x1dd   :  { %p2516_p12 = scmp.lt.s32.totalorder %s2514_s27, %s2510_s26 }
 0x1df   :  { %p2517_p13 = por %p2516_p12, %p2515_p11 }
 0x1e1   :  { %p2518_p0 = pnand %p2517_p13, %p2511_p10 }
 0x1e3   :  { %2521 = shalt.err (!%p2518_p0)
}
 0x1e4   :  { %s2522_s30 = scalar_lea.hbm %s2726_s3, 32 }
 0x1e5   :  { %p2523_p1 = scmp.ne.s32.totalorder %s2726_s3, %s2522_s30  ;;  %p2526_p2 = scmp.lt.u32.totalorder %s2522_s30, %s2726_s3 }
 0x1e7   :  { %p2528_p3 = pnand %p2526_p2, %p2523_p1 }
 0x1e9   :  { %2531 = shalt.err (!%p2528_p3)
}
 0x1ea   :  { %s2547_s8 = smov 32   ;;  %s2548_s1 = smov 2  }
 0x1eb   :  { %1585 = dma.vmem_to_hbm [thread:$0]  %s1580_s25, 32, %s2726_s3, [#allocation4], %s2547_s8, %s2547_s8, %s2548_s1  }
 0x1ec   :  { %2536 = dma.done.wait [#allocation4], 128  }
 0x1ed   :  { %2537 = vsyncadd [#allocation4], 4294967168 }
 0x1ee   :  { %1589 = vsyncpa [#allocation3], 1 }
 0x1ef   :  { %1590 = vsyncpa [#allocation6], 1 }
 0x1f0   :  { %1591 = vsyncpa [#allocation4], 1 }

</bundles_post_ra>
